<compile_context>
chip_gen: v6e
topology: v6e:2x2x1
jax: 0.10.0
libtpu: 0.0.40
codegen_flags: <defaults>
</compile_context>

<pallas_src>
import functools

import numpy as np
import jax
import jax.numpy as jnp
from jax import lax
from jax.experimental import pallas as pl
from jax.experimental.pallas import tpu as pltpu


# ----------------------------------------------------------------------------
# Constant selection matrices (built on host, passed as small inputs)
# ----------------------------------------------------------------------------
def _build_gather_mats(T, K, A):
    """Selection matrices for per-type-group broadcasts done on the MXU."""
    TA = T * A
    m_cls = np.zeros((TA, TA), np.float32)   # gt_class -> every lane of its group
    m_vis = np.zeros((TA, TA), np.float32)   # gt_visibility -> X-offset lanes
    m_grp = np.zeros((TA, TA), np.float32)   # per-field (type / color) group sums
    for t in range(T):
        b = t * A
        m_cls[b + A - 1, b:b + A] = 1.0
        for k in range(K):
            m_vis[b + 2 * K + k, b + k] = 1.0
        ts, te = b + 3 * K, b + 3 * K + 9
        cs, ce = b + 3 * K + 9, b + 3 * K + 12
        m_grp[ts:te, ts:te] = 1.0
        m_grp[cs:ce, cs:ce] = 1.0
    return m_cls, m_vis, m_grp


# ----------------------------------------------------------------------------
# Pallas kernel
# ----------------------------------------------------------------------------
def _loss_kernel(pred_ref, gt_ref, mcls_ref, mvis_ref, mgrp_ref, wvec_ref,
                 out_ref, acc_main, acc_w, *, K, A, T, TA, M, padded):
    i = pl.program_id(0)
    eps = jnp.float32(1e-9)

    @pl.when(i == 0)
    def _init():
        acc_main[...] = jnp.zeros(acc_main.shape, acc_main.dtype)
        acc_w[...] = jnp.zeros(acc_w.shape, acc_w.dtype)

    pred = pred_ref[...]            # (tm, TA) f32
    gt = gt_ref[...]                # (tm, TA) f32
    tm = pred.shape[0]

    # ---- lane-field masks (single-vreg (1, TA) ops; negligible per step) ----
    col = lax.broadcasted_iota(jnp.int32, (1, TA), 1)
    false = jnp.zeros((1, TA), jnp.bool_)
    m_xoff, m_vis, m_type, m_color, m_cls = false, false, false, false, false
    for t in range(T):
        b = t * A
        m_xoff = m_xoff | ((col >= b) & (col < b + K))
        m_vis = m_vis | ((col >= b + 2 * K) & (col < b + 3 * K))
        m_type = m_type | ((col >= b + 3 * K) & (col < b + 3 * K + 9))
        m_color = m_color | ((col >= b + 3 * K + 9) & (col < b + 3 * K + 12))
        m_cls = m_cls | (col == b + A - 1)
    m_bce = m_vis | m_cls
    m_tc = m_type | m_color

    # ---- per-type-group broadcasts on the (idle) MXU -------------------------
    # gt_class of group t copied to every lane of group t.
    cls_b = jnp.dot(gt, mcls_ref[...], preferred_element_type=jnp.float32)
    # gt_visibility of group t moved onto the X-offset lanes of group t.
    vis_x = jnp.dot(gt, mvis_ref[...], preferred_element_type=jnp.float32)

    # ---- BCE terms (visibility + lane existence), in their own lanes --------
    p_safe = jnp.where(m_bce, pred, 0.5)
    logp = jnp.log(p_safe + eps)
    log1mp = jnp.log(1.0 - p_safe + eps)
    g_bce = jnp.where(m_bce, gt, 0.0)
    # eps placement matches the original module (asymmetric on purpose):
    # vis lanes use (1 - gt + eps), the class lane uses (1 - gt).
    c2 = jnp.where(m_bce, 1.0 - gt, 0.0) + jnp.where(m_vis, eps, 0.0)
    bce_elem = g_bce * logp + c2 * log1mp

    # ---- L1 X-offset term (xoff lanes of every group) ------------------------
    l1_elem = jnp.where(m_xoff, jnp.abs(cls_b * vis_x * (pred - gt)), 0.0)

    # ---- soft-target CE for type / color (per-group logsumexp) --------------
    neg_big = jnp.float32(-1e30)
    # Row-global max over all type/color lanes for stabilization; per-group
    # sums via the MXU selection matrix give the exact per-group logsumexp.
    m_row = jnp.max(jnp.where(m_tc, pred, neg_big), axis=1, keepdims=True)
    e = jnp.where(m_tc, jnp.exp(pred - m_row), 0.0)
    gsum = jnp.dot(e, mgrp_ref[...], preferred_element_type=jnp.float32)
    lse = m_row + jnp.log(jnp.where(m_tc, gsum, 1.0))
    ce_elem = jnp.where(m_tc, gt * (lse - pred), 0.0)

    contrib = bce_elem + l1_elem + ce_elem
    if padded:
        # Only the BCE eps term leaks on zero-padded tail rows; mask it.
        row = lax.broadcasted_iota(jnp.int32, (tm, 1), 0)
        valid = ((i * tm + row) < M).astype(jnp.float32)
        contrib = contrib * valid

    # Row-reduce to a (1, TA) partial per step; no full-tile accumulator RMW.
    acc_main[...] += jnp.sum(contrib, axis=0, keepdims=True)
    # Weight factor for loss_type/loss_color (wvec applied once in finalize).
    acc_w[...] += jnp.sum(cls_b * (gt == 1.0).astype(jnp.float32),
                          axis=0, keepdims=True)

    @pl.when(i == pl.num_programs(0) - 1)
    def _finalize():
        rm = acc_main[...]                       # (1, TA)
        rw = acc_w[...] * wvec_ref[...]          # type/color weights applied once
        s_vis = jnp.sum(jnp.where(m_vis, rm, 0.0), keepdims=True)
        s_cls = jnp.sum(jnp.where(m_cls, rm, 0.0), keepdims=True)
        s_l1 = jnp.sum(jnp.where(m_xoff, rm, 0.0), keepdims=True)
        s_cet = jnp.sum(jnp.where(m_type, rm, 0.0), keepdims=True)
        s_cec = jnp.sum(jnp.where(m_color, rm, 0.0), keepdims=True)
        s_wt = jnp.sum(jnp.where(m_type, rw, 0.0), keepdims=True)
        s_wc = jnp.sum(jnp.where(m_color, rw, 0.0), keepdims=True)
        loss0 = -s_vis / jnp.float32(K)
        loss1 = -s_cls
        loss2 = s_l1
        # Original module broadcasts (M,1)*(M,) -> (M,M) before summing,
        # which factorizes into sum(gt_class*weight) * sum(CE).
        loss_type = s_wt * s_cet
        loss_color = s_wc * s_cec
        out_ref[...] = (10.0 * loss0 + loss1 + loss2
                        + 0.01 * loss_type + 0.01 * loss_color)


# ----------------------------------------------------------------------------
# Wrapper
# ----------------------------------------------------------------------------
def laneline_loss_gflat_3d(pred_3D_lanes, gt_3D_lanes, gt_hcam, idx,
                           type_weight, color_weight, *,
                           num_types, num_y_steps, max_rows_per_tile=4096):
    del idx       # unused by the original forward as well
    del gt_hcam   # only feeds the loss_width / loss_height branch (TODO below)
    N, W, CA = pred_3D_lanes.shape
    K = num_y_steps
    T = num_types
    A = 3 * K + 1 + 12
    TA = T * A
    assert CA == TA
    assert W == 32, "original forward hard-codes the [:16]/[16:] split (W must be 32)"

    # Fold num_types into the lane axis: rows = N*W, lanes = T*A = 111.
    # The original [:16]/[16:] regroup only permutes rows (type index kept),
    # and every dense loss term is a permutation-invariant full sum.
    pred = pred_3D_lanes.reshape(N * W, TA).astype(jnp.float32)
    gt = gt_3D_lanes.reshape(N * W, TA).astype(jnp.float32)
    M = N * W

    if M <= max_rows_per_tile:
        tm = M                      # single grid step, whole problem in VMEM
        num_tiles = 1
        padded = False
    else:
        tm = max_rows_per_tile      # multiple of 8
        num_tiles = pl.cdiv(M, tm)
        m_pad = num_tiles * tm
        padded = (m_pad != M)
        if padded:                  # zero-pad tail rows; masked in the kernel
            pred = jnp.pad(pred, ((0, m_pad - M), (0, 0)))
            gt = jnp.pad(gt, ((0, m_pad - M), (0, 0)))

    # Constant selection matrices + type/color weight row (host-built).
    mcls, mvis, mgrp = _build_gather_mats(T, K, A)
    tw = np.asarray(type_weight, np.float32).reshape(9)
    cw = np.asarray(color_weight, np.float32).reshape(3)
    wvec = np.zeros((1, TA), np.float32)
    for t in range(T):
        b = t * A
        wvec[0, b + 3 * K:b + 3 * K + 9] = tw
        wvec[0, b + 3 * K + 9:b + 3 * K + 12] = cw

    kernel = functools.partial(_loss_kernel, K=K, A=A, T=T, TA=TA, M=M,
                               padded=padded)
    total = pl.pallas_call(
        kernel,
        out_shape=jax.ShapeDtypeStruct((1, 1), jnp.float32),
        grid_spec=pltpu.PrefetchScalarGridSpec(
            num_scalar_prefetch=0,
            grid=(num_tiles,),
            in_specs=[
                pl.BlockSpec((tm, TA), lambda i: (i, 0)),
                pl.BlockSpec((tm, TA), lambda i: (i, 0)),
                pl.BlockSpec((TA, TA), lambda i: (0, 0)),
                pl.BlockSpec((TA, TA), lambda i: (0, 0)),
                pl.BlockSpec((TA, TA), lambda i: (0, 0)),
                pl.BlockSpec((1, TA), lambda i: (0, 0)),
            ],
            out_specs=pl.BlockSpec((1, 1), lambda i: (0, 0)),
            scratch_shapes=[pltpu.VMEM((1, TA), jnp.float32),
                            pltpu.VMEM((1, TA), jnp.float32)],
        ),
        compiler_params=pltpu.CompilerParams(
            dimension_semantics=("arbitrary",),
            vmem_limit_bytes=32 * 1024 * 1024),
    )(pred, gt, jnp.asarray(mcls), jnp.asarray(mvis), jnp.asarray(mgrp),
      jnp.asarray(wvec))

    # TODO(synk): loss_width / loss_height need per-sample, data-dependent,
    # variable-length anchor selection (ragged gathers over gt_class rows);
    # not ported to Pallas here.
    loss_width = jnp.float32(0.0)
    loss_height = jnp.float32(0.0)
    return total[0, 0] + 10.0 * loss_width + 10.0 * loss_height, loss_width


# ----------------------------------------------------------------------------
# Pure-JAX reference for the dense part (permutation-invariant full sums)
# ----------------------------------------------------------------------------
def _reference_loss(pred, gt, tw, cw, num_types, K):
    A = 3 * K + 13
    p = pred.reshape(-1, A).astype(jnp.float32)
    g = gt.reshape(-1, A).astype(jnp.float32)
    eps = 1e-9
    p_xoff, g_xoff = p[:, :K], g[:, :K]
    p_vis, g_vis = p[:, 2 * K:3 * K], g[:, 2 * K:3 * K]
    p_type, g_type = p[:, 3 * K:3 * K + 9], g[:, 3 * K:3 * K + 9]
    p_col, g_col = p[:, 3 * K + 9:3 * K + 12], g[:, 3 * K + 9:3 * K + 12]
    p_cls, g_cls = p[:, A - 1:A], g[:, A - 1:A]
    loss0 = -jnp.sum(g_vis * jnp.log(p_vis + eps)
                     + (1 - g_vis + eps) * jnp.log(1 - p_vis + eps)) / K
    loss1 = -jnp.sum(g_cls * jnp.log(p_cls + eps)
                     + (1 - g_cls) * jnp.log(1 - p_cls + eps))
    loss2 = jnp.sum(jnp.abs(g_cls * g_vis * (p_xoff - g_xoff)))
    ce_t = -jnp.sum(g_type * jax.nn.log_softmax(p_type, axis=-1), axis=-1)
    ce_c = -jnp.sum(g_col * jax.nn.log_softmax(p_col, axis=-1), axis=-1)
    w_t = jnp.sum((g_type == 1.0) * tw.reshape(1, 9), axis=-1)
    w_c = jnp.sum((g_col == 1.0) * cw.reshape(1, 3), axis=-1)
    loss_type = jnp.sum(g_cls[:, 0] * w_t) * jnp.sum(ce_t)
    loss_color = jnp.sum(g_cls[:, 0] * w_c) * jnp.sum(ce_c)
    return 10 * loss0 + loss1 + loss2 + 0.01 * loss_type + 0.01 * loss_color


if __name__ == "__main__":
    # Module configuration (small, consistent with the forward pass)
    N = 2                 # batch_size
    num_x_steps = 16      # anchor_x_steps -> W = 2*num_x_steps = 32
    W = 2 * num_x_steps
    T = 3                 # num_types (no_centerline == False)
    K = 8                 # num_y_steps
    A = 3 * K + 1 + 12    # anchor_dim = 37

    key = jax.random.PRNGKey(0)
    k1, k2, k3, k4, k5, k6 = jax.random.split(key, 6)

    # pred: sigmoid-like values in (0,1); also serve as type/color logits.
    pred_3D_lanes = jax.random.uniform(k1, (N, W, T * A), dtype=jnp.float32,
                                       minval=0.05, maxval=0.95)

    # gt: structured ground truth
    gt_xoff = jax.random.uniform(k2, (N, W, T, 2 * K), dtype=jnp.float32,
                                 minval=-1.0, maxval=1.0)
    gt_vis = (jax.random.uniform(k3, (N, W, T, K)) > 0.5).astype(jnp.float32)
    gt_type = jax.nn.one_hot(jax.random.randint(k4, (N, W, T), 0, 9), 9,
                             dtype=jnp.float32)
    gt_color = jax.nn.one_hot(jax.random.randint(k5, (N, W, T), 0, 3), 3,
                              dtype=jnp.float32)
    gt_cls = (jax.random.uniform(k6, (N, W, T, 1)) > 0.5).astype(jnp.float32)
    gt_3D_lanes = jnp.concatenate([gt_xoff, gt_vis, gt_type, gt_color, gt_cls],
                                  axis=-1).reshape(N, W, T * A)

    gt_hcam = jnp.full((N,), 1.5, jnp.float32)
    idx = jnp.arange(N, dtype=jnp.int32)
    type_weight = jnp.linspace(0.5, 2.0, 9).astype(jnp.float32)
    color_weight = jnp.array([1.0, 1.5, 2.0], jnp.float32)

    total, loss_width = laneline_loss_gflat_3d(
        pred_3D_lanes, gt_3D_lanes, gt_hcam, idx, type_weight, color_weight,
        num_types=T, num_y_steps=K)
    total = jax.block_until_ready(total)

    ref = _reference_loss(pred_3D_lanes, gt_3D_lanes, type_weight, color_weight,
                          T, K)
    ref = jax.block_until_ready(ref)

    np.testing.assert_allclose(np.asarray(total), np.asarray(ref),
                               rtol=2e-3, atol=2e-3)
    print("KERNEL_OK")
</pallas_src>

<mosaic_0001>
module attributes {stable_mosaic.version = 11 : i64} {
  func.func @_loss_kernel(%arg0: i32, %arg1: memref<64x111xf32, #tpu.memory_space<vmem>>, %arg2: memref<64x111xf32, #tpu.memory_space<vmem>>, %arg3: memref<111x111xf32, #tpu.memory_space<vmem>>, %arg4: memref<111x111xf32, #tpu.memory_space<vmem>>, %arg5: memref<111x111xf32, #tpu.memory_space<vmem>>, %arg6: memref<1x111xf32, #tpu.memory_space<vmem>>, %arg7: memref<1x1xf32, #tpu.memory_space<vmem>>, %arg8: memref<1x111xf32, #tpu.memory_space<vmem>>, %arg9: memref<1x111xf32, #tpu.memory_space<vmem>>) attributes {dimension_semantics = [#tpu.dimension_semantics<arbitrary>], iteration_bounds = array<i64: 1>, scalar_prefetch = 0 : i64, scratch_operands = 2 : i64, tpu.core_type = #tpu.core_type<tc>, window_params = [{transform_indices = @transform_0, window_bounds = array<i64: 64, 111>}, {transform_indices = @transform_1, window_bounds = array<i64: 64, 111>}, {pipeline_mode = #tpu.pipeline_mode<synchronous>, transform_indices = @transform_2, window_bounds = array<i64: 111, 111>}, {pipeline_mode = #tpu.pipeline_mode<synchronous>, transform_indices = @transform_3, window_bounds = array<i64: 111, 111>}, {pipeline_mode = #tpu.pipeline_mode<synchronous>, transform_indices = @transform_4, window_bounds = array<i64: 111, 111>}, {pipeline_mode = #tpu.pipeline_mode<synchronous>, transform_indices = @transform_5, window_bounds = array<i64: 1, 111>}, {pipeline_mode = #tpu.pipeline_mode<synchronous>, transform_indices = @transform_6, window_bounds = array<i64: 1, 1>}]} {
    %c0_i32 = arith.constant 0 : i32
    %0 = arith.cmpi eq, %arg0, %c0_i32 : i32
    %1 = arith.extui %0 : i1 to i32
    %c0_i32_0 = arith.constant 0 : i32
    %2 = arith.cmpi ne, %1, %c0_i32_0 : i32
    scf.if %2 {
      %cst_50 = arith.constant 0.000000e+00 : f32
      %180 = vector.broadcast %cst_50 : f32 to vector<1x111xf32>
      %c0_51 = arith.constant 0 : index
      %c0_52 = arith.constant 0 : index
      %181 = vector.load %arg8[%c0_51, %c0_52] : memref<1x111xf32, #tpu.memory_space<vmem>>, vector<1x111xf32>
      tpu.vector_store %arg8[%c0_51, %c0_52], %180 {strides = array<i32>} : memref<1x111xf32, #tpu.memory_space<vmem>>, vector<1x111xf32>,
      %cst_53 = arith.constant 0.000000e+00 : f32
      %182 = vector.broadcast %cst_53 : f32 to vector<1x111xf32>
      %c0_54 = arith.constant 0 : index
      %c0_55 = arith.constant 0 : index
      %183 = vector.load %arg9[%c0_54, %c0_55] : memref<1x111xf32, #tpu.memory_space<vmem>>, vector<1x111xf32>
      tpu.vector_store %arg9[%c0_54, %c0_55], %182 {strides = array<i32>} : memref<1x111xf32, #tpu.memory_space<vmem>>, vector<1x111xf32>,
    } else {
    }
    %c0 = arith.constant 0 : index
    %c0_1 = arith.constant 0 : index
    %3 = vector.load %arg1[%c0, %c0_1] : memref<64x111xf32, #tpu.memory_space<vmem>>, vector<64x111xf32>
    %c0_2 = arith.constant 0 : index
    %c0_3 = arith.constant 0 : index
    %4 = vector.load %arg2[%c0_2, %c0_3] : memref<64x111xf32, #tpu.memory_space<vmem>>, vector<64x111xf32>
    %5 = tpu.iota {dimensions = array<i32: 1>} : vector<1x111xi32>
    %false = arith.constant false
    %6 = vector.broadcast %false : i1 to vector<1x111xi1>
    %c0_i32_4 = arith.constant 0 : i32
    %7 = vector.broadcast %c0_i32_4 : i32 to vector<1x111xi32>
    %8 = arith.cmpi sge, %5, %7 : vector<1x111xi32>
    %c8_i32 = arith.constant 8 : i32
    %9 = vector.broadcast %c8_i32 : i32 to vector<1x111xi32>
    %10 = arith.cmpi slt, %5, %9 : vector<1x111xi32>
    %11 = arith.andi %8, %10 : vector<1x111xi1>
    %12 = arith.ori %6, %11 : vector<1x111xi1>
    %c16_i32 = arith.constant 16 : i32
    %13 = vector.broadcast %c16_i32 : i32 to vector<1x111xi32>
    %14 = arith.cmpi sge, %5, %13 : vector<1x111xi32>
    %c24_i32 = arith.constant 24 : i32
    %15 = vector.broadcast %c24_i32 : i32 to vector<1x111xi32>
    %16 = arith.cmpi slt, %5, %15 : vector<1x111xi32>
    %17 = arith.andi %14, %16 : vector<1x111xi1>
    %18 = arith.ori %6, %17 : vector<1x111xi1>
    %c24_i32_5 = arith.constant 24 : i32
    %19 = vector.broadcast %c24_i32_5 : i32 to vector<1x111xi32>
    %20 = arith.cmpi sge, %5, %19 : vector<1x111xi32>
    %c33_i32 = arith.constant 33 : i32
    %21 = vector.broadcast %c33_i32 : i32 to vector<1x111xi32>
    %22 = arith.cmpi slt, %5, %21 : vector<1x111xi32>
    %23 = arith.andi %20, %22 : vector<1x111xi1>
    %24 = arith.ori %6, %23 : vector<1x111xi1>
    %c33_i32_6 = arith.constant 33 : i32
    %25 = vector.broadcast %c33_i32_6 : i32 to vector<1x111xi32>
    %26 = arith.cmpi sge, %5, %25 : vector<1x111xi32>
    %c36_i32 = arith.constant 36 : i32
    %27 = vector.broadcast %c36_i32 : i32 to vector<1x111xi32>
    %28 = arith.cmpi slt, %5, %27 : vector<1x111xi32>
    %29 = arith.andi %26, %28 : vector<1x111xi1>
    %30 = arith.ori %6, %29 : vector<1x111xi1>
    %c36_i32_7 = arith.constant 36 : i32
    %31 = vector.broadcast %c36_i32_7 : i32 to vector<1x111xi32>
    %32 = arith.cmpi eq, %5, %31 : vector<1x111xi32>
    %33 = arith.ori %6, %32 : vector<1x111xi1>
    %c37_i32 = arith.constant 37 : i32
    %34 = vector.broadcast %c37_i32 : i32 to vector<1x111xi32>
    %35 = arith.cmpi sge, %5, %34 : vector<1x111xi32>
    %c45_i32 = arith.constant 45 : i32
    %36 = vector.broadcast %c45_i32 : i32 to vector<1x111xi32>
    %37 = arith.cmpi slt, %5, %36 : vector<1x111xi32>
    %38 = arith.andi %35, %37 : vector<1x111xi1>
    %39 = arith.ori %12, %38 : vector<1x111xi1>
    %c53_i32 = arith.constant 53 : i32
    %40 = vector.broadcast %c53_i32 : i32 to vector<1x111xi32>
    %41 = arith.cmpi sge, %5, %40 : vector<1x111xi32>
    %c61_i32 = arith.constant 61 : i32
    %42 = vector.broadcast %c61_i32 : i32 to vector<1x111xi32>
    %43 = arith.cmpi slt, %5, %42 : vector<1x111xi32>
    %44 = arith.andi %41, %43 : vector<1x111xi1>
    %45 = arith.ori %18, %44 : vector<1x111xi1>
    %c61_i32_8 = arith.constant 61 : i32
    %46 = vector.broadcast %c61_i32_8 : i32 to vector<1x111xi32>
    %47 = arith.cmpi sge, %5, %46 : vector<1x111xi32>
    %c70_i32 = arith.constant 70 : i32
    %48 = vector.broadcast %c70_i32 : i32 to vector<1x111xi32>
    %49 = arith.cmpi slt, %5, %48 : vector<1x111xi32>
    %50 = arith.andi %47, %49 : vector<1x111xi1>
    %51 = arith.ori %24, %50 : vector<1x111xi1>
    %c70_i32_9 = arith.constant 70 : i32
    %52 = vector.broadcast %c70_i32_9 : i32 to vector<1x111xi32>
    %53 = arith.cmpi sge, %5, %52 : vector<1x111xi32>
    %c73_i32 = arith.constant 73 : i32
    %54 = vector.broadcast %c73_i32 : i32 to vector<1x111xi32>
    %55 = arith.cmpi slt, %5, %54 : vector<1x111xi32>
    %56 = arith.andi %53, %55 : vector<1x111xi1>
    %57 = arith.ori %30, %56 : vector<1x111xi1>
    %c73_i32_10 = arith.constant 73 : i32
    %58 = vector.broadcast %c73_i32_10 : i32 to vector<1x111xi32>
    %59 = arith.cmpi eq, %5, %58 : vector<1x111xi32>
    %60 = arith.ori %33, %59 : vector<1x111xi1>
    %c74_i32 = arith.constant 74 : i32
    %61 = vector.broadcast %c74_i32 : i32 to vector<1x111xi32>
    %62 = arith.cmpi sge, %5, %61 : vector<1x111xi32>
    %c82_i32 = arith.constant 82 : i32
    %63 = vector.broadcast %c82_i32 : i32 to vector<1x111xi32>
    %64 = arith.cmpi slt, %5, %63 : vector<1x111xi32>
    %65 = arith.andi %62, %64 : vector<1x111xi1>
    %66 = arith.ori %39, %65 : vector<1x111xi1>
    %c90_i32 = arith.constant 90 : i32
    %67 = vector.broadcast %c90_i32 : i32 to vector<1x111xi32>
    %68 = arith.cmpi sge, %5, %67 : vector<1x111xi32>
    %c98_i32 = arith.constant 98 : i32
    %69 = vector.broadcast %c98_i32 : i32 to vector<1x111xi32>
    %70 = arith.cmpi slt, %5, %69 : vector<1x111xi32>
    %71 = arith.andi %68, %70 : vector<1x111xi1>
    %72 = arith.ori %45, %71 : vector<1x111xi1>
    %c98_i32_11 = arith.constant 98 : i32
    %73 = vector.broadcast %c98_i32_11 : i32 to vector<1x111xi32>
    %74 = arith.cmpi sge, %5, %73 : vector<1x111xi32>
    %c107_i32 = arith.constant 107 : i32
    %75 = vector.broadcast %c107_i32 : i32 to vector<1x111xi32>
    %76 = arith.cmpi slt, %5, %75 : vector<1x111xi32>
    %77 = arith.andi %74, %76 : vector<1x111xi1>
    %78 = arith.ori %51, %77 : vector<1x111xi1>
    %c107_i32_12 = arith.constant 107 : i32
    %79 = vector.broadcast %c107_i32_12 : i32 to vector<1x111xi32>
    %80 = arith.cmpi sge, %5, %79 : vector<1x111xi32>
    %c110_i32 = arith.constant 110 : i32
    %81 = vector.broadcast %c110_i32 : i32 to vector<1x111xi32>
    %82 = arith.cmpi slt, %5, %81 : vector<1x111xi32>
    %83 = arith.andi %80, %82 : vector<1x111xi1>
    %84 = arith.ori %57, %83 : vector<1x111xi1>
    %c110_i32_13 = arith.constant 110 : i32
    %85 = vector.broadcast %c110_i32_13 : i32 to vector<1x111xi32>
    %86 = arith.cmpi eq, %5, %85 : vector<1x111xi32>
    %87 = arith.ori %60, %86 : vector<1x111xi1>
    %88 = arith.ori %72, %87 : vector<1x111xi1>
    %89 = arith.ori %78, %84 : vector<1x111xi1>
    %c0_14 = arith.constant 0 : index
    %c0_15 = arith.constant 0 : index
    %90 = vector.load %arg3[%c0_14, %c0_15] : memref<111x111xf32, #tpu.memory_space<vmem>>, vector<111x111xf32>
    %cst = arith.constant dense<0.000000e+00> : vector<64x111xf32>
    %91 = tpu.matmul %4, %90, %cst {dimension_numbers = #tpu.dot_dimension_numbers<[1], [0], [0], [1], [0, 0, 1, 1], [], []>} : vector<64x111xf32>, vector<111x111xf32>, vector<64x111xf32> -> vector<64x111xf32>
    %c0_16 = arith.constant 0 : index
    %c0_17 = arith.constant 0 : index
    %92 = vector.load %arg4[%c0_16, %c0_17] : memref<111x111xf32, #tpu.memory_space<vmem>>, vector<111x111xf32>
    %cst_18 = arith.constant dense<0.000000e+00> : vector<64x111xf32>
    %93 = tpu.matmul %4, %92, %cst_18 {dimension_numbers = #tpu.dot_dimension_numbers<[1], [0], [0], [1], [0, 0, 1, 1], [], []>} : vector<64x111xf32>, vector<111x111xf32>, vector<64x111xf32> -> vector<64x111xf32>
    %cst_19 = arith.constant 5.000000e-01 : f32
    %94 = vector.shape_cast %88 : vector<1x111xi1> to vector<1x111xi1>
    %95 = vector.broadcast %94 : vector<1x111xi1> to vector<64x111xi1>
    %96 = vector.broadcast %cst_19 : f32 to vector<64x111xf32>
    %97 = arith.select %95, %3, %96 : vector<64x111xi1>, vector<64x111xf32>
    %cst_20 = arith.constant 9.99999971E-10 : f32
    %98 = vector.broadcast %cst_20 : f32 to vector<64x111xf32>
    %99 = arith.addf %97, %98 : vector<64x111xf32>
    %100 = math.log %99 : vector<64x111xf32>
    %cst_21 = arith.constant 1.000000e+00 : f32
    %101 = vector.broadcast %cst_21 : f32 to vector<64x111xf32>
    %102 = arith.subf %101, %97 : vector<64x111xf32>
    %cst_22 = arith.constant 9.99999971E-10 : f32
    %103 = vector.broadcast %cst_22 : f32 to vector<64x111xf32>
    %104 = arith.addf %102, %103 : vector<64x111xf32>
    %105 = math.log %104 : vector<64x111xf32>
    %cst_23 = arith.constant 0.000000e+00 : f32
    %106 = vector.shape_cast %88 : vector<1x111xi1> to vector<1x111xi1>
    %107 = vector.broadcast %106 : vector<1x111xi1> to vector<64x111xi1>
    %108 = vector.broadcast %cst_23 : f32 to vector<64x111xf32>
    %109 = arith.select %107, %4, %108 : vector<64x111xi1>, vector<64x111xf32>
    %cst_24 = arith.constant 1.000000e+00 : f32
    %110 = vector.broadcast %cst_24 : f32 to vector<64x111xf32>
    %111 = arith.subf %110, %4 : vector<64x111xf32>
    %cst_25 = arith.constant 0.000000e+00 : f32
    %112 = vector.shape_cast %88 : vector<1x111xi1> to vector<1x111xi1>
    %113 = vector.broadcast %112 : vector<1x111xi1> to vector<64x111xi1>
    %114 = vector.broadcast %cst_25 : f32 to vector<64x111xf32>
    %115 = arith.select %113, %111, %114 : vector<64x111xi1>, vector<64x111xf32>
    %cst_26 = arith.constant 9.99999971E-10 : f32
    %cst_27 = arith.constant 0.000000e+00 : f32
    %116 = vector.broadcast %cst_26 : f32 to vector<1x111xf32>
    %117 = vector.broadcast %cst_27 : f32 to vector<1x111xf32>
    %118 = arith.select %72, %116, %117 : vector<1x111xi1>, vector<1x111xf32>
    %119 = vector.broadcast %118 : vector<1x111xf32> to vector<64x111xf32>
    %120 = arith.addf %115, %119 : vector<64x111xf32>
    %121 = arith.mulf %109, %100 : vector<64x111xf32>
    %122 = arith.mulf %120, %105 : vector<64x111xf32>
    %123 = arith.addf %121, %122 : vector<64x111xf32>
    %124 = arith.mulf %91, %93 : vector<64x111xf32>
    %125 = arith.subf %3, %4 : vector<64x111xf32>
    %126 = arith.mulf %124, %125 : vector<64x111xf32>
    %127 = math.absf %126 : vector<64x111xf32>
    %cst_28 = arith.constant 0.000000e+00 : f32
    %128 = vector.shape_cast %66 : vector<1x111xi1> to vector<1x111xi1>
    %129 = vector.broadcast %128 : vector<1x111xi1> to vector<64x111xi1>
    %130 = vector.broadcast %cst_28 : f32 to vector<64x111xf32>
    %131 = arith.select %129, %127, %130 : vector<64x111xi1>, vector<64x111xf32>
    %cst_29 = arith.constant -1.000000e+30 : f32
    %132 = vector.shape_cast %89 : vector<1x111xi1> to vector<1x111xi1>
    %133 = vector.broadcast %132 : vector<1x111xi1> to vector<64x111xi1>
    %134 = vector.broadcast %cst_29 : f32 to vector<64x111xf32>
    %135 = arith.select %133, %3, %134 : vector<64x111xi1>, vector<64x111xf32>
    %cst_30 = arith.constant dense<0xFF800000> : vector<64xf32>
    %136 = vector.multi_reduction <maximumf>, %135, %cst_30 [1] : vector<64x111xf32> to vector<64xf32>
    %137 = vector.shape_cast %136 : vector<64xf32> to vector<64x1xf32>
    %138 = vector.broadcast %137 : vector<64x1xf32> to vector<64x111xf32>
    %139 = arith.subf %3, %138 : vector<64x111xf32>
    %140 = math.exp %139 : vector<64x111xf32>
    %cst_31 = arith.constant 0.000000e+00 : f32
    %141 = vector.shape_cast %89 : vector<1x111xi1> to vector<1x111xi1>
    %142 = vector.broadcast %141 : vector<1x111xi1> to vector<64x111xi1>
    %143 = vector.broadcast %cst_31 : f32 to vector<64x111xf32>
    %144 = arith.select %142, %140, %143 : vector<64x111xi1>, vector<64x111xf32>
    %c0_32 = arith.constant 0 : index
    %c0_33 = arith.constant 0 : index
    %145 = vector.load %arg5[%c0_32, %c0_33] : memref<111x111xf32, #tpu.memory_space<vmem>>, vector<111x111xf32>
    %cst_34 = arith.constant dense<0.000000e+00> : vector<64x111xf32>
    %146 = tpu.matmul %144, %145, %cst_34 {dimension_numbers = #tpu.dot_dimension_numbers<[1], [0], [0], [1], [0, 0, 1, 1], [], []>} : vector<64x111xf32>, vector<111x111xf32>, vector<64x111xf32> -> vector<64x111xf32>
    %cst_35 = arith.constant 1.000000e+00 : f32
    %147 = vector.shape_cast %89 : vector<1x111xi1> to vector<1x111xi1>
    %148 = vector.broadcast %147 : vector<1x111xi1> to vector<64x111xi1>
    %149 = vector.broadcast %cst_35 : f32 to vector<64x111xf32>
    %150 = arith.select %148, %146, %149 : vector<64x111xi1>, vector<64x111xf32>
    %151 = math.log %150 : vector<64x111xf32>
    %152 = vector.broadcast %137 : vector<64x1xf32> to vector<64x111xf32>
    %153 = arith.addf %152, %151 : vector<64x111xf32>
    %154 = arith.subf %153, %3 : vector<64x111xf32>
    %155 = arith.mulf %4, %154 : vector<64x111xf32>
    %cst_36 = arith.constant 0.000000e+00 : f32
    %156 = vector.shape_cast %89 : vector<1x111xi1> to vector<1x111xi1>
    %157 = vector.broadcast %156 : vector<1x111xi1> to vector<64x111xi1>
    %158 = vector.broadcast %cst_36 : f32 to vector<64x111xf32>
    %159 = arith.select %157, %155, %158 : vector<64x111xi1>, vector<64x111xf32>
    %160 = arith.addf %123, %131 : vector<64x111xf32>
    %161 = arith.addf %160, %159 : vector<64x111xf32>
    %c0_37 = arith.constant 0 : index
    %c0_38 = arith.constant 0 : index
    %162 = vector.load %arg8[%c0_37, %c0_38] : memref<1x111xf32, #tpu.memory_space<vmem>>, vector<1x111xf32>
    %cst_39 = arith.constant dense<0.000000e+00> : vector<111xf32>
    %163 = vector.multi_reduction <add>, %161, %cst_39 [0] : vector<64x111xf32> to vector<111xf32>
    %164 = vector.shape_cast %163 : vector<111xf32> to vector<1x111xf32>
    %165 = arith.addf %162, %164 : vector<1x111xf32>
    %c0_40 = arith.constant 0 : index
    %c0_41 = arith.constant 0 : index
    %166 = vector.load %arg8[%c0_40, %c0_41] : memref<1x111xf32, #tpu.memory_space<vmem>>, vector<1x111xf32>
    tpu.vector_store %arg8[%c0_40, %c0_41], %165 {strides = array<i32>} : memref<1x111xf32, #tpu.memory_space<vmem>>, vector<1x111xf32>,
    %c0_42 = arith.constant 0 : index
    %c0_43 = arith.constant 0 : index
    %167 = vector.load %arg9[%c0_42, %c0_43] : memref<1x111xf32, #tpu.memory_space<vmem>>, vector<1x111xf32>
    %cst_44 = arith.constant 1.000000e+00 : f32
    %168 = vector.broadcast %cst_44 : f32 to vector<64x111xf32>
    %169 = arith.cmpf oeq, %4, %168 : vector<64x111xf32>
    %170 = arith.extui %169 : vector<64x111xi1> to vector<64x111xi32>
    %171 = arith.sitofp %170 : vector<64x111xi32> to vector<64x111xf32>
    %172 = arith.mulf %91, %171 : vector<64x111xf32>
    %cst_45 = arith.constant dense<0.000000e+00> : vector<111xf32>
    %173 = vector.multi_reduction <add>, %172, %cst_45 [0] : vector<64x111xf32> to vector<111xf32>
    %174 = vector.shape_cast %173 : vector<111xf32> to vector<1x111xf32>
    %175 = arith.addf %167, %174 : vector<1x111xf32>
    %c0_46 = arith.constant 0 : index
    %c0_47 = arith.constant 0 : index
    %176 = vector.load %arg9[%c0_46, %c0_47] : memref<1x111xf32, #tpu.memory_space<vmem>>, vector<1x111xf32>
    tpu.vector_store %arg9[%c0_46, %c0_47], %175 {strides = array<i32>} : memref<1x111xf32, #tpu.memory_space<vmem>>, vector<1x111xf32>,
    %c0_i32_48 = arith.constant 0 : i32
    %177 = arith.cmpi eq, %arg0, %c0_i32_48 : i32
    %178 = arith.extui %177 : i1 to i32
    %c0_i32_49 = arith.constant 0 : i32
    %179 = arith.cmpi ne, %178, %c0_i32_49 : i32
    scf.if %179 {
      %c0_50 = arith.constant 0 : index
      %c0_51 = arith.constant 0 : index
      %180 = vector.load %arg8[%c0_50, %c0_51] : memref<1x111xf32, #tpu.memory_space<vmem>>, vector<1x111xf32>
      %c0_52 = arith.constant 0 : index
      %c0_53 = arith.constant 0 : index
      %181 = vector.load %arg9[%c0_52, %c0_53] : memref<1x111xf32, #tpu.memory_space<vmem>>, vector<1x111xf32>
      %c0_54 = arith.constant 0 : index
      %c0_55 = arith.constant 0 : index
      %182 = vector.load %arg6[%c0_54, %c0_55] : memref<1x111xf32, #tpu.memory_space<vmem>>, vector<1x111xf32>
      %183 = arith.mulf %181, %182 : vector<1x111xf32>
      %cst_56 = arith.constant 0.000000e+00 : f32
      %184 = vector.broadcast %cst_56 : f32 to vector<1x111xf32>
      %185 = arith.select %72, %180, %184 : vector<1x111xi1>, vector<1x111xf32>
      %186 = vector.shape_cast %185 : vector<1x111xf32> to vector<1x1x111xf32>
      %cst_57 = arith.constant dense<0.000000e+00> : vector<1xf32>
      %187 = vector.multi_reduction <add>, %186, %cst_57 [1, 2] : vector<1x1x111xf32> to vector<1xf32>
      %188 = vector.shape_cast %187 : vector<1xf32> to vector<1x1x1xf32>
      %189 = vector.extract %188[0, 0, 0] : f32 from vector<1x1x1xf32>
      %190 = vector.broadcast %189 : f32 to vector<1x1xf32>
      %cst_58 = arith.constant 0.000000e+00 : f32
      %191 = vector.broadcast %cst_58 : f32 to vector<1x111xf32>
      %192 = arith.select %87, %180, %191 : vector<1x111xi1>, vector<1x111xf32>
      %193 = vector.shape_cast %192 : vector<1x111xf32> to vector<1x1x111xf32>
      %cst_59 = arith.constant dense<0.000000e+00> : vector<1xf32>
      %194 = vector.multi_reduction <add>, %193, %cst_59 [1, 2] : vector<1x1x111xf32> to vector<1xf32>
      %195 = vector.shape_cast %194 : vector<1xf32> to vector<1x1x1xf32>
      %196 = vector.extract %195[0, 0, 0] : f32 from vector<1x1x1xf32>
      %197 = vector.broadcast %196 : f32 to vector<1x1xf32>
      %cst_60 = arith.constant 0.000000e+00 : f32
      %198 = vector.broadcast %cst_60 : f32 to vector<1x111xf32>
      %199 = arith.select %66, %180, %198 : vector<1x111xi1>, vector<1x111xf32>
      %200 = vector.shape_cast %199 : vector<1x111xf32> to vector<1x1x111xf32>
      %cst_61 = arith.constant dense<0.000000e+00> : vector<1xf32>
      %201 = vector.multi_reduction <add>, %200, %cst_61 [1, 2] : vector<1x1x111xf32> to vector<1xf32>
      %202 = vector.shape_cast %201 : vector<1xf32> to vector<1x1x1xf32>
      %203 = vector.extract %202[0, 0, 0] : f32 from vector<1x1x1xf32>
      %204 = vector.broadcast %203 : f32 to vector<1x1xf32>
      %cst_62 = arith.constant 0.000000e+00 : f32
      %205 = vector.broadcast %cst_62 : f32 to vector<1x111xf32>
      %206 = arith.select %78, %180, %205 : vector<1x111xi1>, vector<1x111xf32>
      %207 = vector.shape_cast %206 : vector<1x111xf32> to vector<1x1x111xf32>
      %cst_63 = arith.constant dense<0.000000e+00> : vector<1xf32>
      %208 = vector.multi_reduction <add>, %207, %cst_63 [1, 2] : vector<1x1x111xf32> to vector<1xf32>
      %209 = vector.shape_cast %208 : vector<1xf32> to vector<1x1x1xf32>
      %210 = vector.extract %209[0, 0, 0] : f32 from vector<1x1x1xf32>
      %211 = vector.broadcast %210 : f32 to vector<1x1xf32>
      %cst_64 = arith.constant 0.000000e+00 : f32
      %212 = vector.broadcast %cst_64 : f32 to vector<1x111xf32>
      %213 = arith.select %84, %180, %212 : vector<1x111xi1>, vector<1x111xf32>
      %214 = vector.shape_cast %213 : vector<1x111xf32> to vector<1x1x111xf32>
      %cst_65 = arith.constant dense<0.000000e+00> : vector<1xf32>
      %215 = vector.multi_reduction <add>, %214, %cst_65 [1, 2] : vector<1x1x111xf32> to vector<1xf32>
      %216 = vector.shape_cast %215 : vector<1xf32> to vector<1x1x1xf32>
      %217 = vector.extract %216[0, 0, 0] : f32 from vector<1x1x1xf32>
      %218 = vector.broadcast %217 : f32 to vector<1x1xf32>
      %cst_66 = arith.constant 0.000000e+00 : f32
      %219 = vector.broadcast %cst_66 : f32 to vector<1x111xf32>
      %220 = arith.select %78, %183, %219 : vector<1x111xi1>, vector<1x111xf32>
      %221 = vector.shape_cast %220 : vector<1x111xf32> to vector<1x1x111xf32>
      %cst_67 = arith.constant dense<0.000000e+00> : vector<1xf32>
      %222 = vector.multi_reduction <add>, %221, %cst_67 [1, 2] : vector<1x1x111xf32> to vector<1xf32>
      %223 = vector.shape_cast %222 : vector<1xf32> to vector<1x1x1xf32>
      %224 = vector.extract %223[0, 0, 0] : f32 from vector<1x1x1xf32>
      %225 = vector.broadcast %224 : f32 to vector<1x1xf32>
      %cst_68 = arith.constant 0.000000e+00 : f32
      %226 = vector.broadcast %cst_68 : f32 to vector<1x111xf32>
      %227 = arith.select %84, %183, %226 : vector<1x111xi1>, vector<1x111xf32>
      %228 = vector.shape_cast %227 : vector<1x111xf32> to vector<1x1x111xf32>
      %cst_69 = arith.constant dense<0.000000e+00> : vector<1xf32>
      %229 = vector.multi_reduction <add>, %228, %cst_69 [1, 2] : vector<1x1x111xf32> to vector<1xf32>
      %230 = vector.shape_cast %229 : vector<1xf32> to vector<1x1x1xf32>
      %231 = vector.extract %230[0, 0, 0] : f32 from vector<1x1x1xf32>
      %232 = vector.broadcast %231 : f32 to vector<1x1xf32>
      %cst_70 = arith.constant 0.000000e+00 : f32
      %233 = vector.broadcast %cst_70 : f32 to vector<1x1xf32>
      %234 = arith.subf %233, %190 : vector<1x1xf32>
      %cst_71 = arith.constant 8.000000e+00 : f32
      %235 = vector.broadcast %cst_71 : f32 to vector<1x1xf32>
      %236 = arith.divf %234, %235 : vector<1x1xf32>
      %cst_72 = arith.constant 0.000000e+00 : f32
      %237 = vector.broadcast %cst_72 : f32 to vector<1x1xf32>
      %238 = arith.subf %237, %197 : vector<1x1xf32>
      %239 = arith.mulf %225, %211 : vector<1x1xf32>
      %240 = arith.mulf %232, %218 : vector<1x1xf32>
      %cst_73 = arith.constant 1.000000e+01 : f32
      %241 = vector.broadcast %cst_73 : f32 to vector<1x1xf32>
      %242 = arith.mulf %241, %236 : vector<1x1xf32>
      %243 = arith.addf %242, %238 : vector<1x1xf32>
      %244 = arith.addf %243, %204 : vector<1x1xf32>
      %cst_74 = arith.constant 0.00999999977 : f32
      %245 = vector.broadcast %cst_74 : f32 to vector<1x1xf32>
      %246 = arith.mulf %245, %239 : vector<1x1xf32>
      %247 = arith.addf %244, %246 : vector<1x1xf32>
      %cst_75 = arith.constant 0.00999999977 : f32
      %248 = vector.broadcast %cst_75 : f32 to vector<1x1xf32>
      %249 = arith.mulf %248, %240 : vector<1x1xf32>
      %250 = arith.addf %247, %249 : vector<1x1xf32>
      %c0_76 = arith.constant 0 : index
      %c0_77 = arith.constant 0 : index
      %251 = vector.load %arg7[%c0_76, %c0_77] : memref<1x1xf32, #tpu.memory_space<vmem>>, vector<1x1xf32>
      tpu.vector_store %arg7[%c0_76, %c0_77], %250 {strides = array<i32>} : memref<1x1xf32, #tpu.memory_space<vmem>>, vector<1x1xf32>,
    } else {
    }
    return
  }
  func.func @transform_0(%arg0: i32) -> (i32, i32) {
    %c0_i32 = arith.constant 0 : i32
    %c0_i32_0 = arith.constant 0 : i32
    return %arg0, %c0_i32 : i32, i32
  }
  func.func @transform_1(%arg0: i32) -> (i32, i32) {
    %c0_i32 = arith.constant 0 : i32
    %c0_i32_0 = arith.constant 0 : i32
    return %arg0, %c0_i32 : i32, i32
  }
  func.func @transform_2(%arg0: i32) -> (i32, i32) {
    %c0_i32 = arith.constant 0 : i32
    %c0_i32_0 = arith.constant 0 : i32
    %c0_i32_1 = arith.constant 0 : i32
    return %c0_i32, %c0_i32_0 : i32, i32
  }
  func.func @transform_3(%arg0: i32) -> (i32, i32) {
    %c0_i32 = arith.constant 0 : i32
    %c0_i32_0 = arith.constant 0 : i32
    %c0_i32_1 = arith.constant 0 : i32
    return %c0_i32, %c0_i32_0 : i32, i32
  }
  func.func @transform_4(%arg0: i32) -> (i32, i32) {
    %c0_i32 = arith.constant 0 : i32
    %c0_i32_0 = arith.constant 0 : i32
    %c0_i32_1 = arith.constant 0 : i32
    return %c0_i32, %c0_i32_0 : i32, i32
  }
  func.func @transform_5(%arg0: i32) -> (i32, i32) {
    %c0_i32 = arith.constant 0 : i32
    %c0_i32_0 = arith.constant 0 : i32
    %c0_i32_1 = arith.constant 0 : i32
    return %c0_i32, %c0_i32_0 : i32, i32
  }
  func.func @transform_6(%arg0: i32) -> (i32, i32) {
    %c0_i32 = arith.constant 0 : i32
    %c0_i32_0 = arith.constant 0 : i32
    %c0_i32_1 = arith.constant 0 : i32
    return %c0_i32, %c0_i32_0 : i32, i32
  }
}

</mosaic_0001>

<bundles_post_ra>
// kernel: tpu_custom_call.1
= control target key start
LH: loop header
LB: loop body
LE: loop exit
PB: predicated region body
PF: predicated region fallthrough
CT: control target
= control target key end

     0   :  { %11 = vsyncpa [#allocation5], 0  ;;  %s2268_s0 = inlined_call_operand.hbm [shape: f32[64,111], index: 0, kind: input, shape index: {}]   ;;  %s2269_s1 = inlined_call_operand.hbm [shape: f32[64,111], index: 1, kind: input, shape index: {}]   ;;  %s2270_s2 = inlined_call_operand.hbm [shape: f32[111,111], index: 2, kind: input, shape index: {}]   ;;  %s2271_s3 = inlined_call_operand.hbm [shape: f32[111,111], index: 3, kind: input, shape index: {}]   ;;  %s2272_s4 = inlined_call_operand.hbm [shape: f32[111,111], index: 4, kind: input, shape index: {}]   ;;  %s2273_s5 = inlined_call_operand.vmem [shape: f32[1,111], index: 5, kind: input, shape index: {}]   ;;  %s2274_s6 = inlined_call_operand.hbm [shape: f32[1,1], index: 6, kind: output, shape index: {}]  }
   0x1   :  { %12 = vsyncpa [#allocation8], 0 }
   0x2   :  { %13 = vsyncpa [#allocation11], 0 }
   0x3   :  { %14 = vsyncpa [#allocation6], 0  ;;  %s1564_s21 = smov [#allocation7]   ;;  %s1565_s23 = smov [#allocation10]  }
   0x4   :  { %s32_s22 = sshll.u32 %s1564_s21, 4  ;;  %s56_s24 = sshll.u32 %s1565_s23, 4  ;;  %s33_s22 = int_to_ptr.vmem [resolvable:$true] %s32_s22  ;;  %s57_s24 = int_to_ptr.vmem [resolvable:$true] %s56_s24 }
   0x5   :  { %s1444_s25 = scalar_lea.vmem %s33_s22, 1024  ;;  %p1449_p1 = scmp.lt.s32.totalorder %s33_s22, %s33_s22 }
   0x6   :  { %p1445_p0 = scmp.ne.s32.totalorder %s33_s22, %s1444_s25  ;;  %p1450_p2 = scmp.lt.s32.totalorder %s1444_s25, %s1444_s25 }
   0x8   :  { %p1451_p3 = por %p1450_p2, %p1449_p1 }
   0xa   :  { %p1452_p4 = pnand %p1451_p3, %p1445_p0 }
   0xc   :  { %1455 = shalt.err (!%p1452_p4)
}
   0xd   :  { %s1566_s26 = smov 128   ;;  %s1567_s27 = smov 8  }
   0xe   :  { %38 = dma.hbm_to_vmem [thread:$0]  %s2269_s1, 1024, %s33_s22, [#allocation8], %s1566_s26, %s1566_s26, %s1567_s27  }
   0xf   :  { %s1464_s30 = scalar_lea.vmem %s57_s24, 1792  ;;  %p1469_p6 = scmp.lt.s32.totalorder %s57_s24, %s57_s24 }
  0x10   :  { %p1465_p5 = scmp.ne.s32.totalorder %s57_s24, %s1464_s30  ;;  %p1470_p7 = scmp.lt.s32.totalorder %s1464_s30, %s1464_s30 }
  0x12   :  { %p1471_p8 = por %p1470_p7, %p1469_p6 }
  0x14   :  { %p1472_p9 = pnand %p1471_p8, %p1465_p5 }
  0x16   :  { %1475 = shalt.err (!%p1472_p9)
}
  0x17   :  { %62 = dma.hbm_to_vmem [thread:$0]  %s2271_s3, 1792, %s57_s24, [#allocation11], %s1566_s26, %s1566_s26, %s1567_s27  }
  0x18   :  { %s1568_s9 = smov [#allocation4]   ;;  %s1569_s11 = smov [#allocation9]  }
  0x19   :  { %s20_s10 = sshll.u32 %s1568_s9, 4  ;;  %s44_s12 = sshll.u32 %s1569_s11, 4  ;;  %s21_s10 = int_to_ptr.vmem [resolvable:$true] %s20_s10  ;;  %s45_s12 = int_to_ptr.vmem [resolvable:$true] %s44_s12 }
  0x1a   :  { %s1484_s1 = scalar_lea.vmem %s21_s10, 1024  ;;  %p1489_p11 = scmp.lt.s32.totalorder %s21_s10, %s21_s10 }
  0x1b   :  { %p1485_p10 = scmp.ne.s32.totalorder %s21_s10, %s1484_s1  ;;  %p1490_p12 = scmp.lt.s32.totalorder %s1484_s1, %s1484_s1 }
  0x1d   :  { %p1491_p13 = por %p1490_p12, %p1489_p11 }
  0x1f   :  { %p1492_p0 = pnand %p1491_p13, %p1485_p10 }
  0x21   :  { %1495 = shalt.err (!%p1492_p0)
}
  0x22   :  { %26 = dma.hbm_to_vmem [thread:$0]  %s2268_s0, 1024, %s21_s10, [#allocation5], %s1566_s26, %s1566_s26, %s1567_s27  }
  0x23   :  { %s1504_s3 = scalar_lea.vmem %s45_s12, 1792  ;;  %p1509_p2 = scmp.lt.s32.totalorder %s45_s12, %s45_s12 }
  0x24   :  { %p1505_p1 = scmp.ne.s32.totalorder %s45_s12, %s1504_s3  ;;  %p1510_p3 = scmp.lt.s32.totalorder %s1504_s3, %s1504_s3 }
  0x26   :  { %p1511_p4 = por %p1510_p3, %p1509_p2 }
  0x28   :  { %p1512_p5 = pnand %p1511_p4, %p1505_p1 }
  0x2a   :  { %1515 = shalt.err (!%p1512_p5)
}
  0x2b   :  { %50 = dma.hbm_to_vmem [thread:$0]  %s2270_s2, 1792, %s45_s12, [#allocation8], %s1566_s26, %s1566_s26, %s1567_s27  }
  0x2c   :  { %s1570_s17 = smov [#allocation12]  }
  0x2d   :  { %s68_s18 = sshll.u32 %s1570_s17, 4  ;;  %s69_s18 = int_to_ptr.vmem [resolvable:$true] %s68_s18 }
  0x2e   :  { %s1524_s19 = scalar_lea.vmem %s69_s18, 1792  ;;  %p1529_p7 = scmp.lt.s32.totalorder %s69_s18, %s69_s18 }
  0x2f   :  { %p1525_p6 = scmp.ne.s32.totalorder %s69_s18, %s1524_s19  ;;  %p1530_p8 = scmp.lt.s32.totalorder %s1524_s19, %s1524_s19 }
  0x31   :  { %p1531_p9 = por %p1530_p8, %p1529_p7 }
  0x33   :  { %p1532_p10 = pnand %p1531_p9, %p1525_p6 }
  0x35   :  { %1535 = shalt.err (!%p1532_p10)
}
  0x36   :  { %74 = dma.hbm_to_vmem [thread:$0]  %s2272_s4, 1792, %s69_s18, [#allocation11], %s1566_s26, %s1566_s26, %s1567_s27  }
  0x37   :  { %1556 = dma.done.wait [#allocation5], 1024  }
  0x38   :  { %1557 = vsyncadd [#allocation5], 4294966272 }
  0x39   :  { %1558 = dma.done.wait [#allocation8], 2816  }
  0x3a   :  { %1559 = vsyncadd [#allocation8], 4294964480 }
  0x3b   :  { %1560 = dma.done.wait [#allocation11], 3584  }
  0x3c   :  { %1561 = vsyncadd [#allocation11], 4294963712  ;;  %v115_v0 = vlaneseq  ;;  %vm207_vm15 = vcmask 1046528   ;;  %v181_v5 = vld [vmem:[#allocation9 + $0x68] sm:$0x7f]  ;;  %v180_v6 = vld [vmem:[#allocation9 + $0x60] sm:$0xff] }
  0x3d   :  { %v2307_v7 = vmov 0  ;;  %1192 = vmatprep.subr.msk.mxu0 %vm207_vm15, %v181_v5  ;;  %v1676_v8 = vld [vmem:[#allocation4] sm:$0xff]  ;;  %v1678_v9 = vld [vmem:[#allocation4 + $0x10] sm:$0xff]  ;;  %v179_v10 = vld [vmem:[#allocation9 + $0x58] sm:$0xff]  ;;  %v2310_v12 = vmov 0  ;;  %v1571_v17 = vmov 0  }
  0x3e   :  { %v1639_v1 = vand.u32 127, %v115_v0  ;;  %1193 = vmatpush3.msk.msra.mxu0 %vm207_vm15, %v181_v5  ;;  %v329_v11 = vld [vmem:[#allocation10 + $0x68] sm:$0x7f]  ;;  %v1685_v13 = vld [vmem:[#allocation4 + $0x8] sm:$0xff]  ;;  %v328_v14 = vld [vmem:[#allocation10 + $0x60] sm:$0xff]  ;;  %s1573_s27 = smov [#allocation13]  }
  0x3f   :  { %1194 = vmatprep.subr.mxu0 %v180_v6  ;;  %1232 = vmatprep.subr.msk.mxu1 %vm207_vm15, %v329_v11  ;;  %v178_v15 = vld [vmem:[#allocation9 + $0x50] sm:$0xff]  ;;  %v327_v16 = vld [vmem:[#allocation10 + $0x58] sm:$0xff]  ;;  %v1696_v19 = vld [vmem:[#allocation4 + $0x18] sm:$0xff]  ;;  %s1080_s28 = sshll.u32 %s1573_s27, 4  ;;  %s1081_s28 = int_to_ptr.vmem [resolvable:$true] %s1080_s28 }
  0x40   :  { %vm123_vm0 = vcmp.ge.s32.totalorder %v1639_v1, 24  ;;  %vm124_vm1 = vcmp.lt.s32.totalorder %v1639_v1, 33  ;;  %vm126_vm2 = vcmp.ge.s32.totalorder %v1639_v1, 33  ;;  %vm127_vm3 = vcmp.lt.s32.totalorder %v1639_v1, 36  ;;  %1195 = vmatpush3.msra.mxu0 %v180_v6  ;;  %1233 = vmatpush3.msk.msra.mxu1 %vm207_vm15, %v329_v11  ;;  %v177_v20 = vld [vmem:[#allocation9 + $0x48] sm:$0xff]  ;;  %v326_v21 = vld [vmem:[#allocation10 + $0x50] sm:$0xff]  ;;  %p1541_p12 = scmp.lt.s32.totalorder %s1081_s28, %s1081_s28 }
  0x41   :  { %vm1645_vm4 = vmand %vm123_vm0, %vm124_vm1  ;;  %vm138_vm5 = vcmp.ge.s32.totalorder %v1639_v1, 61  ;;  %vm139_vm6 = vcmp.lt.s32.totalorder %v1639_v1, 70  ;;  %vm142_vm8 = vcmp.ge.s32.totalorder %v1639_v1, 70  ;;  %vm143_vm9 = vcmp.lt.s32.totalorder %v1639_v1, 73  ;;  %1196 = vmatprep.subr.mxu0 %v179_v10  ;;  %1234 = vmatprep.subr.mxu1 %v328_v14  ;;  %v1713_v28 = vld [vmem:[#allocation4 + $0x20] sm:$0xff]  ;;  %v1715_v29 = vld [vmem:[#allocation4 + $0x28] sm:$0xff] }
  0x42   :  { %vm1651_vm7 = vmand %vm126_vm2, %vm127_vm3  ;;  %vm156_vm12 = vcmp.ge.s32.totalorder %v1639_v1, 98  ;;  %vm157_vm13 = vcmp.lt.s32.totalorder %v1639_v1, 107  ;;  %vm160_vm1 = vcmp.ge.s32.totalorder %v1639_v1, 107  ;;  %vm161_vm2 = vcmp.lt.s32.totalorder %v1639_v1, 110  ;;  %1197 = vmatpush3.msra.mxu0 %v179_v10  ;;  %1235 = vmatpush3.msra.mxu1 %v328_v14  ;;  %v176_v30 = vld [vmem:[#allocation9 + $0x40] sm:$0xff]  ;;  %v325_v31 = vld [vmem:[#allocation10 + $0x48] sm:$0xff] }
  0x43   :  { %vm140_vm10 = vmand %vm138_vm5, %vm139_vm6  ;;  %1198 = vmatprep.subr.mxu0 %v178_v15  ;;  %1236 = vmatprep.subr.mxu1 %v327_v16  ;;  %v1725_v36 = vld [vmem:[#allocation4 + $0x30] sm:$0xff]  ;;  %v1727_v37 = vld [vmem:[#allocation4 + $0x38] sm:$0xff]  ;;  %s1536_s29 = scalar_lea.vmem %s1081_s28, 16  ;;  %s1540_s30 = scalar_lea.vmem %s1081_s28, 32 }
  0x44   :  { %vm141_vm11 = vmor %vm1645_vm4, %vm140_vm10  ;;  %1199 = vmatpush3.msra.mxu0 %v178_v15  ;;  %1237 = vmatpush3.msra.mxu1 %v327_v16  ;;  %2313 = vst [vmem:[#allocation20_spill] sm:$0xff] %v1725_v36  ;;  %v175_v38 = vld [vmem:[#allocation9 + $0x38] sm:$0xff]  ;;  %v324_v39 = vld [vmem:[#allocation10 + $0x40] sm:$0xff]  ;;  %vm2275_vm10 = vcmask 901120   ;;  %p1537_p11 = scmp.ne.s32.totalorder %s1081_s28, %s1536_s29  ;;  %p1542_p13 = scmp.lt.s32.totalorder %s1540_s30, %s1536_s29 }
  0x45   :  { %vm1661_vm14 = vmand %vm142_vm8, %vm143_vm9  ;;  %vm2276_vm8 = vcmask 908288   ;;  %1200 = vmatprep.subr.mxu0 %v177_v20  ;;  %1238 = vmatprep.subr.mxu1 %v326_v21  ;;  %2314 = vst [vmem:[#allocation21_spill] sm:$0xff] %v1727_v37  ;;  %v174_v44 = vld [vmem:[#allocation9 + $0x30] sm:$0xff]  ;;  %v323_v45 = vld [vmem:[#allocation10 + $0x38] sm:$0xff] }
  0x46   :  { %vm145_vm0 = vmor %vm1651_vm7, %vm1661_vm14  ;;  %1201 = vmatpush3.msra.mxu0 %v177_v20  ;;  %1239 = vmatpush3.msra.mxu1 %v326_v21  ;;  %v173_v46 = vld [vmem:[#allocation9 + $0x28] sm:$0xff]  ;;  %v322_v47 = vld [vmem:[#allocation10 + $0x30] sm:$0xff]  ;;  %p1543_p0 = por %p1542_p13, %p1541_p12 }
  0x47   :  { %vm158_vm3 = vmand %vm156_vm12, %vm157_vm13  ;;  %1202 = vmatprep.subr.mxu0 %v176_v30  ;;  %1240 = vmatprep.subr.mxu1 %v325_v31  ;;  %v172_v50 = vld [vmem:[#allocation9 + $0x20] sm:$0xff]  ;;  %v321_v51 = vld [vmem:[#allocation10 + $0x28] sm:$0xff] }
  0x48   :  { %vm1671_vm4 = vmor %vm141_vm11, %vm158_vm3  ;;  %1203 = vmatpush3.msra.mxu0 %v176_v30  ;;  %1241 = vmatpush3.msra.mxu1 %v325_v31  ;;  %v171_v52 = vld [vmem:[#allocation9 + $0x18] sm:$0xff]  ;;  %v320_v53 = vld [vmem:[#allocation10 + $0x20] sm:$0xff]  ;;  %v1572_v30 = vmov 0.0   ;;  %vm120_vm3 = vcmp.ge.s32.totalorder %v1639_v1, 16  ;;  %p1544_p1 = pnand %p1543_p0, %p1537_p11 }
  0x49   :  { %v2308_v7 = vsel %vm1671_vm4, 4294967295, %v2307_v7  ;;  %vm162_vm5 = vmand %vm160_vm1, %vm161_vm2  ;;  %1204 = vmatprep.subr.mxu0 %v175_v38  ;;  %1242 = vmatprep.subr.mxu1 %v324_v39  ;;  %v1739_v54 = vld [vmem:[#allocation7] sm:$0xff]  ;;  %v170_v55 = vld [vmem:[#allocation9 + $0x10] sm:$0xff]  ;;  %98 = vst.msk [vmem:[#allocation3] sm:$0x1] %vm2275_vm10, %v1572_v30 }
  0x4a   :  { %2309 = vst [vmem:[#allocation18_spill] sm:$0xff] %v2308_v7  ;;  %vm1681_vm6 = vmor %vm145_vm0, %vm162_vm5  ;;  %1205 = vmatpush3.msra.mxu0 %v175_v38  ;;  %1243 = vmatpush3.msra.mxu1 %v324_v39  ;;  %v319_v56 = vld [vmem:[#allocation10 + $0x18] sm:$0xff]  ;;  %v318_v58 = vld [vmem:[#allocation10 + $0x10] sm:$0xff]  ;;  %vm913_vm12 = vcmp.eq.f32.partialorder %v1739_v54, 1.0  ;;  %vm121_vm5 = vcmp.lt.s32.totalorder %v1639_v1, 24 }
  0x4b   :  { %v2311_v12 = vsel %vm1681_vm6, 4294967295, %v2310_v12  ;;  %vm167_vm7 = vmor %vm1671_vm4, %vm1681_vm6  ;;  %1206 = vmatprep.subr.mxu0 %v174_v44  ;;  %1244 = vmatprep.subr.mxu1 %v323_v45  ;;  %2315 = vst [vmem:[#allocation22_spill] sm:$0xff] %v1739_v54  ;;  %v169_v57 = vld [vmem:[#allocation9 + $0x8] sm:$0xff]  ;;  %v168_v59 = vld [vmem:[#allocation9] sm:$0xff] }
  0x4c   :  { %2312 = vst [vmem:[#allocation19_spill] sm:$0xff] %v2311_v12  ;;  %v1694_v18 = vsel %vm167_vm7, 1, %v1571_v17  ;;  %1207 = vmatpush3.msra.mxu0 %v174_v44  ;;  %1245 = vmatpush3.msra.mxu1 %v323_v45  ;;  %v317_v60 = vld [vmem:[#allocation10 + $0x8] sm:$0xff]  ;;  %v1743_v61 = vld [vmem:[#allocation7 + $0x8] sm:$0xff]  ;;  %v1745_v62 = vld [vmem:[#allocation7 + $0x10] sm:$0xff]  ;;  %vm134_vm7 = vcmp.ge.s32.totalorder %v1639_v1, 53 }
  0x4d   :  { %vm2277_vm9 = vcmp.eq.s32.totalorder %v1694_v18, 1  ;;  %1208 = vmatprep.subr.mxu0 %v173_v46  ;;  %1246 = vmatprep.subr.mxu1 %v322_v47  ;;  %2316 = vst [vmem:[#allocation23_spill] sm:$0xff] %v1743_v61  ;;  %v316_v63 = vld [vmem:[#allocation10] sm:$0xff]  ;;  %v682_v0 = vld [vmem:[#allocation12 + $0x68] sm:$0x7f]  ;;  %v1751_v2 = vld [vmem:[#allocation7 + $0x18] sm:$0xff] }
  0x4e   :  { %v605_v22 = vsel %vm2277_vm9, %v1676_v8, -1e+30  ;;  %v607_v23 = vsel %vm2277_vm9, %v1678_v9, -1e+30  ;;  %v606_v24 = vsel %vm2277_vm9, %v1685_v13, -1e+30  ;;  %1209 = vmatpush3.msra.mxu0 %v173_v46  ;;  %1247 = vmatpush3.msra.mxu1 %v322_v47 }
  0x4f   :  { %v613_v25 = vsel %vm2276_vm8, %v605_v22, -inf  ;;  %v619_v26 = vsel %vm2276_vm8, %v607_v23, -inf  ;;  %v608_v27 = vsel %vm2277_vm9, %v1696_v19, -1e+30  ;;  %v616_v32 = vsel %vm2276_vm8, %v606_v24, -inf  ;;  %1210 = vmatprep.subr.mxu0 %v172_v50  ;;  %1248 = vmatprep.subr.mxu1 %v321_v51  ;;  %v1753_v3 = vld [vmem:[#allocation7 + $0x20] sm:$0xff] }
  0x50   :  { %614 = vmax.xlane.f32.xlu0 %v613_v25  ;;  %620 = vmax.xlane.f32.xlu1 %v619_v26  ;;  %v622_v33 = vsel %vm2276_vm8, %v608_v27, -inf  ;;  %v609_v34 = vsel %vm2277_vm9, %v1713_v28, -1e+30  ;;  %v610_v35 = vsel %vm2277_vm9, %v1715_v29, -1e+30  ;;  %v681_v4 = vld [vmem:[#allocation12 + $0x60] sm:$0xff] }
  0x51   :  { %v625_v40 = vsel %vm2276_vm8, %v609_v34, -inf  ;;  %v628_v41 = vsel %vm2276_vm8, %v610_v35, -inf  ;;  %v611_v42 = vsel %vm2277_vm9, %v1725_v36, -1e+30  ;;  %v612_v43 = vsel %vm2277_vm9, %v1727_v37, -1e+30  ;;  %1211 = vmatpush3.msra.mxu0 %v172_v50  ;;  %1249 = vmatpush3.msra.mxu1 %v321_v51 }
  0x52   :  { %v631_v48 = vsel %vm2276_vm8, %v611_v42, -inf  ;;  %v634_v49 = vsel %vm2276_vm8, %v612_v43, -inf  ;;  %1212 = vmatprep.subr.mxu0 %v171_v52  ;;  %1250 = vmatprep.subr.mxu1 %v320_v53  ;;  %v1765_v5 = vld [vmem:[#allocation7 + $0x28] sm:$0xff]  ;;  %v680_v6 = vld [vmem:[#allocation12 + $0x58] sm:$0xff]  ;;  %v1768_v10 = vld [vmem:[#allocation7 + $0x30] sm:$0xff]  ;;  %vm914_vm11 = vcmp.eq.f32.partialorder %v1743_v61, 1.0 }
  0x53   :  { %1213 = vmatpush3.msra.mxu0 %v171_v52  ;;  %1220 = vmatprep.mubr.msk.f32.mxu0 %vm2276_vm8, %v1739_v54  ;;  %2317 = vst [vmem:[#allocation24_spill] sm:$0xff] %v1768_v10  ;;  %v679_v11 = vld [vmem:[#allocation12 + $0x50] sm:$0xff]  ;;  %v1775_v14 = vld [vmem:[#allocation7 + $0x38] sm:$0xff]  ;;  %v678_v15 = vld [vmem:[#allocation12 + $0x48] sm:$0xff]  ;;  %vm916_vm13 = vcmp.eq.f32.partialorder %v1751_v2, 1.0  ;;  %vm915_vm14 = vcmp.eq.f32.partialorder %v1745_v62, 1.0 }
  0x54   :  { %617 = vmax.xlane.f32.xlu0 %v616_v32  ;;  %623 = vmax.xlane.f32.xlu1 %v622_v33  ;;  %v677_v16 = vld [vmem:[#allocation12 + $0x40] sm:$0xff]  ;;  %v676_v20 = vld [vmem:[#allocation12 + $0x38] sm:$0xff]  ;;  %v675_v21 = vld [vmem:[#allocation12 + $0x30] sm:$0xff]  ;;  %97 = vst.msk [vmem:[#allocation2] sm:$0x1] %vm2275_vm10, %v1572_v30  ;;  %vm917_vm0 = vcmp.eq.f32.partialorder %v1753_v3, 1.0 }
  0x55   :  { %1214 = vmatprep.subr.mxu0 %v170_v55  ;;  %1251 = vmatpush3.msra.mxu1 %v320_v53  ;;  %v674_v22 = vld [vmem:[#allocation12 + $0x28] sm:$0xff]  ;;  %v673_v23 = vld [vmem:[#allocation12 + $0x20] sm:$0xff]  ;;  %v672_v24 = vld [vmem:[#allocation12 + $0x18] sm:$0xff]  ;;  %vm920_vm1 = vcmp.eq.f32.partialorder %v1775_v14, 1.0  ;;  %vm919_vm2 = vcmp.eq.f32.partialorder %v1768_v10, 1.0 }
  0x56   :  { %1215 = vmatpush3.msra.mxu0 %v170_v55  ;;  %1252 = vmatprep.subr.mxu1 %v319_v56  ;;  %v671_v25 = vld [vmem:[#allocation12 + $0x10] sm:$0xff]  ;;  %v670_v26 = vld [vmem:[#allocation12 + $0x8] sm:$0xff]  ;;  %v669_v27 = vld [vmem:[#allocation12] sm:$0xff] }
  0x57   :  { %1216 = vmatprep.subr.mxu0 %v169_v57  ;;  %1253 = vmatpush3.msra.mxu1 %v319_v56 }
  0x58   :  { %626 = vmax.xlane.f32.xlu0 %v625_v40  ;;  %629 = vmax.xlane.f32.xlu1 %v628_v41 }
  0x59   :  { %1217 = vmatpush3.msra.mxu0 %v169_v57  ;;  %1254 = vmatprep.subr.mxu1 %v318_v58 }
  0x5a   :  { %1218 = vmatprep.subr.mxu0 %v168_v59  ;;  %1255 = vmatpush3.msra.mxu1 %v318_v58 }
  0x5b   :  { %1219 = vmatpush3.msra.mxu0 %v168_v59  ;;  %1256 = vmatprep.subr.mxu1 %v317_v60 }
  0x5c   :  { %632 = vmax.xlane.f32.xlu0 %v631_v48  ;;  %635 = vmax.xlane.f32.xlu1 %v634_v49 }
  0x5d   :  { %1221 = vmatmul.mubr.msk.f32.vlgmr.msra.gmra.mxu0 %vm2276_vm8, %v1743_v61  ;;  %1257 = vmatpush3.msra.mxu1 %v317_v60 }
  0x5e   :  { %1223 = vmatprep.mubr.msk.f32.mxu0 %vm2276_vm8, %v1745_v62  ;;  %1258 = vmatprep.subr.mxu1 %v316_v63 }
  0x5f   :  { %1259 = vmatpush3.msra.mxu1 %v316_v63  ;;  %1260 = vmatprep.mubr.msk.f32.mxu1 %vm2276_vm8, %v1739_v54 }
  0x60   :  { %1261 = vmatmul.mubr.msk.f32.vlgmr.msra.gmra.mxu1 %vm2276_vm8, %v1743_v61  ;;  %1272 = vmatprep.subr.msk.mxu0 %vm207_vm15, %v682_v0 }
  0x61   :  { %1224 = vmatmul.mubr.msk.f32.gmra.mxu0 %vm2276_vm8, %v1751_v2  ;;  %1312 = vmatprep.subr.msk.mxu1 %vm207_vm15, %v682_v0 }
  0x62   :  { %1226 = vmatprep.mubr.msk.f32.mxu0 %vm2276_vm8, %v1753_v3  ;;  %1273 = vmatpush3.msk.msra.mxu0 %vm207_vm15, %v682_v0 }
  0x63   :  { %1274 = vmatprep.subr.mxu0 %v681_v4  ;;  %1326 = vmatpush3.msk.msra.mxu1 %vm207_vm15, %v682_v0  ;;  %vm918_vm15 = vcmp.eq.f32.partialorder %v1765_v5, 1.0 }
  0x64   :  { %1275 = vmatpush3.msra.mxu0 %v681_v4  ;;  %1313 = vmatprep.subr.mxu1 %v681_v4 }
  0x65   :  { %1227 = vmatmul.mubr.msk.f32.gmra.mxu0 %vm2276_vm8, %v1765_v5  ;;  %1276 = vmatprep.subr.mxu0 %v680_v6 }
  0x66   :  { %1229 = vmatprep.mubr.msk.f32.mxu0 %vm2276_vm8, %v1768_v10  ;;  %1277 = vmatpush3.msra.mxu0 %v680_v6 }
  0x67   :  { %1278 = vmatprep.subr.mxu0 %v679_v11  ;;  %1327 = vmatpush3.msra.mxu1 %v681_v4 }
  0x68   :  { %1279 = vmatpush3.msra.mxu0 %v679_v11  ;;  %1314 = vmatprep.subr.mxu1 %v680_v6 }
  0x69   :  { %1230 = vmatmul.mubr.msk.f32.gmra.mxu0 %vm2276_vm8, %v1775_v14  ;;  %1280 = vmatprep.subr.mxu0 %v678_v15 }
  0x6a   :  { %1281 = vmatpush3.msra.mxu0 %v678_v15  ;;  %1328 = vmatpush3.msra.mxu1 %v680_v6 }
  0x6b   :  { %1282 = vmatprep.subr.mxu0 %v677_v16  ;;  %1315 = vmatprep.subr.mxu1 %v679_v11 }
  0x6c   :  { %1283 = vmatpush3.msra.mxu0 %v677_v16  ;;  %1329 = vmatpush3.msra.mxu1 %v679_v11 }
  0x6d   :  { %1284 = vmatprep.subr.mxu0 %v676_v20  ;;  %1263 = vmatprep.mubr.msk.f32.mxu1 %vm2276_vm8, %v1745_v62 }
  0x6e   :  { %1316 = vmatprep.subr.mxu1 %v678_v15  ;;  %1285 = vmatpush3.msra.mxu0 %v676_v20 }
  0x6f   :  { %1264 = vmatmul.mubr.msk.f32.gmra.mxu1 %vm2276_vm8, %v1751_v2  ;;  %1286 = vmatprep.subr.mxu0 %v675_v21 }
  0x70   :  { %1330 = vmatpush3.msra.mxu1 %v678_v15  ;;  %1287 = vmatpush3.msra.mxu0 %v675_v21 }
  0x71   :  { %1317 = vmatprep.subr.mxu1 %v677_v16  ;;  %1288 = vmatprep.subr.mxu0 %v674_v22 }
  0x72   :  { %1331 = vmatpush3.msra.mxu1 %v677_v16  ;;  %1266 = vmatprep.mubr.msk.f32.mxu1 %vm2276_vm8, %v1753_v3 }
  0x73   :  { %1318 = vmatprep.subr.mxu1 %v676_v20  ;;  %1289 = vmatpush3.msra.mxu0 %v674_v22 }
  0x74   :  { %1267 = vmatmul.mubr.msk.f32.gmra.mxu1 %vm2276_vm8, %v1765_v5  ;;  %1290 = vmatprep.subr.mxu0 %v673_v23 }
  0x75   :  { %1332 = vmatpush3.msra.mxu1 %v676_v20  ;;  %1291 = vmatpush3.msra.mxu0 %v673_v23 }
  0x76   :  { %1319 = vmatprep.subr.mxu1 %v675_v21  ;;  %1292 = vmatprep.subr.mxu0 %v672_v24 }
  0x77   :  { %1333 = vmatpush3.msra.mxu1 %v675_v21  ;;  %1269 = vmatprep.mubr.msk.f32.mxu1 %vm2276_vm8, %v1768_v10 }
  0x78   :  { %1320 = vmatprep.subr.mxu1 %v674_v22  ;;  %1293 = vmatpush3.msra.mxu0 %v672_v24 }
  0x79   :  { %1270 = vmatmul.mubr.msk.f32.gmra.mxu1 %vm2276_vm8, %v1775_v14  ;;  %1294 = vmatprep.subr.mxu0 %v671_v25 }
  0x7a   :  { %1334 = vmatpush3.msra.mxu1 %v674_v22  ;;  %1295 = vmatpush3.msra.mxu0 %v671_v25 }
  0x7b   :  { %1321 = vmatprep.subr.mxu1 %v673_v23  ;;  %1296 = vmatprep.subr.mxu0 %v670_v26 }
  0x7c   :  { %1335 = vmatpush3.msra.mxu1 %v673_v23  ;;  %1297 = vmatpush3.msra.mxu0 %v670_v26 }
  0x7d   :  { %1322 = vmatprep.subr.mxu1 %v672_v24  ;;  %1298 = vmatprep.subr.mxu0 %v669_v27 }
  0x7e   :  { %1336 = vmatpush3.msra.mxu1 %v672_v24  ;;  %1299 = vmatpush3.msra.mxu0 %v669_v27 }
  0x7f   :  { %1323 = vmatprep.subr.mxu1 %v671_v25 }
  0x80   :  { %1337 = vmatpush3.msra.mxu1 %v671_v25 }
  0x81   :  { %1324 = vmatprep.subr.mxu1 %v670_v26 }
  0x82   :  { %1338 = vmatpush3.msra.mxu1 %v670_v26  ;;  %v1119_v26 = vsel %vm914_vm11, 1.0, %v1572_v30  ;;  %vm135_vm11 = vcmp.lt.s32.totalorder %v1639_v1, 61 }
  0x83   :  { %1325 = vmatprep.subr.mxu1 %v669_v27 }
  0x84   :  { %1339 = vmatpush3.msra.mxu1 %v669_v27 }
  0xd9   :  { %v1795_v31 = vpop.xlane.xlu0 %614  ;;  %v1797_v32 = vpop.xlane.xlu1 %620 }
  0xda   :  { %2318 = vst [vmem:[#allocation25_spill] sm:$0xff] %v1795_v31  ;;  %2319 = vst [vmem:[#allocation26_spill] sm:$0xff] %v1797_v32  ;;  %v637_v33 = vsub.f32 %v1676_v8, %v1795_v31  ;;  %v639_v34 = vsub.f32 %v1678_v9, %v1797_v32 }
  0xdc   :  { %v645_v35 = vmul.f32 1.442695, %v637_v33  ;;  %v649_v38 = vmul.f32 1.442695, %v639_v34  ;;  %v1118_v33 = vsel %vm913_vm12, 1.0, %v1572_v30  ;;  %vm122_vm12 = vmand %vm120_vm3, %vm121_vm5 }
  0xdd   :  { %v1803_v39 = vpop.xlane.xlu0 %617  ;;  %v1805_v40 = vpop.xlane.xlu1 %623 }
  0xde   :  { %2320 = vst [vmem:[#allocation27_spill] sm:$0xff] %v1805_v40  ;;  %1364 = vpow2.f32 %v645_v35  ;;  %v638_v41 = vsub.f32 %v1685_v13, %v1803_v39  ;;  %v640_v42 = vsub.f32 %v1696_v19, %v1805_v40 }
  0xdf   :  { %1366 = vpow2.f32 %v649_v38  ;;  %v1121_v38 = vsel %vm916_vm13, 1.0, %v1572_v30  ;;  %vm136_vm13 = vmand %vm134_vm7, %vm135_vm11  ;;  %vm148_vm7 = vcmp.ge.s32.totalorder %v1639_v1, 74  ;;  %vm149_vm11 = vcmp.lt.s32.totalorder %v1639_v1, 82 }
  0xe0   :  { %v647_v43 = vmul.f32 1.442695, %v638_v41  ;;  %v651_v44 = vmul.f32 1.442695, %v640_v42 }
  0xe1   :  { %v1811_v45 = vpop.xlane.xlu0 %626  ;;  %v1813_v46 = vpop.xlane.xlu1 %629 }
  0xe2   :  { %2321 = vst [vmem:[#allocation28_spill] sm:$0xff] %v1811_v45  ;;  %2322 = vst [vmem:[#allocation29_spill] sm:$0xff] %v1813_v46  ;;  %1368 = vpow2.f32 %v647_v43  ;;  %v641_v47 = vsub.f32 %v1713_v28, %v1811_v45  ;;  %v642_v48 = vsub.f32 %v1715_v29, %v1813_v46 }
  0xe3   :  { %1370 = vpow2.f32 %v651_v44  ;;  %v1120_v44 = vsel %vm915_vm14, 1.0, %v1572_v30  ;;  %vm152_vm14 = vcmp.ge.s32.totalorder %v1639_v1, 90 }
  0xe4   :  { %v653_v49 = vmul.f32 1.442695, %v641_v47  ;;  %v655_v50 = vmul.f32 1.442695, %v642_v48 }
  0xe5   :  { %v1819_v51 = vpop.xlane.xlu0 %632  ;;  %v1821_v52 = vpop.xlane.xlu1 %635 }
  0xe6   :  { %2323 = vst [vmem:[#allocation30_spill] sm:$0xff] %v1819_v51  ;;  %2324 = vst [vmem:[#allocation31_spill] sm:$0xff] %v1821_v52  ;;  %1372 = vpow2.f32 %v653_v49  ;;  %v643_v53 = vsub.f32 %v1725_v36, %v1819_v51  ;;  %v644_v55 = vsub.f32 %v1727_v37, %v1821_v52 }
  0xe7   :  { %1374 = vpow2.f32 %v655_v50 }
  0xe8   :  { %v657_v56 = vmul.f32 1.442695, %v643_v53  ;;  %v659_v57 = vmul.f32 1.442695, %v644_v55  ;;  %v1123_v53 = vsel %vm918_vm15, 1.0, %v1572_v30  ;;  %vm153_vm15 = vcmp.lt.s32.totalorder %v1639_v1, 98 }
  0xea   :  { %1376 = vpow2.f32 %v657_v56 }
  0xeb   :  { %v1365_v58 = vpop.eup %1364  ;;  %1378 = vpow2.f32 %v659_v57  ;;  %v1122_v57 = vsel %vm917_vm0, 1.0, %v1572_v30  ;;  %vm129_vm0 = vcmp.eq.s32.totalorder %v1639_v1, 36 }
  0xec   :  { %v1367_v59 = vpop.eup %1366  ;;  %v661_v60 = vsel %vm2277_vm9, %v1365_v58, 0.0 }
  0xed   :  { %1300 = vmatprep.mubr.msk.f32.mxu0 %vm2276_vm8, %v661_v60  ;;  %v663_v0 = vsel %vm2277_vm9, %v1367_v59, 0.0 }
  0xef   :  { %v1369_v63 = vpop.eup %1368 }
  0xf0   :  { %v1371_v4 = vpop.eup %1370  ;;  %v662_v6 = vsel %vm2277_vm9, %v1369_v63, 0.0 }
  0xf1   :  { %1301 = vmatmul.mubr.msk.f32.vlgmr.msra.gmra.mxu0 %vm2276_vm8, %v662_v6  ;;  %v664_v11 = vsel %vm2277_vm9, %v1371_v4, 0.0  ;;  %v1125_v4 = vsel %vm920_vm1, 1.0, %v1572_v30  ;;  %vm146_vm1 = vcmp.eq.s32.totalorder %v1639_v1, 73 }
  0xf2   :  { %1303 = vmatprep.mubr.msk.f32.mxu0 %vm2276_vm8, %v663_v0 }
  0xf3   :  { %v1373_v15 = vpop.eup %1372 }
  0xf4   :  { %v1375_v16 = vpop.eup %1374  ;;  %v665_v20 = vsel %vm2277_vm9, %v1373_v15, 0.0 }
  0xf5   :  { %1304 = vmatmul.mubr.msk.f32.gmra.mxu0 %vm2276_vm8, %v664_v11  ;;  %1306 = vmatprep.mubr.msk.f32.mxu1 %vm2276_vm8, %v665_v20  ;;  %v666_v21 = vsel %vm2277_vm9, %v1375_v16, 0.0  ;;  %v1124_v16 = vsel %vm919_vm2, 1.0, %v1572_v30  ;;  %vm137_vm2 = vmor %vm122_vm12, %vm136_vm13  ;;  %vm2331_vm12 = vcmp.eq.s32.totalorder %v1694_v18, 1 }
  0xf6   :  { %1307 = vmatmul.mubr.msk.f32.vlgmr.msra.gmra.mxu1 %vm2276_vm8, %v666_v21  ;;  %vm2333_vm13 = vmmov %vm2331_vm12 }
  0xf7   :  { %v1377_v22 = vpop.eup %1376 }
  0xf8   :  { %v1379_v23 = vpop.eup %1378  ;;  %v667_v24 = vsel %vm2277_vm9, %v1377_v22, 0.0 }
  0xf9   :  { %1309 = vmatprep.mubr.msk.f32.mxu1 %vm2276_vm8, %v667_v24  ;;  %v668_v25 = vsel %vm2277_vm9, %v1379_v23, 0.0  ;;  %vm164_vm9 = vcmp.eq.s32.totalorder %v1639_v1, 110 }
  0xfa   :  { %1310 = vmatmul.mubr.msk.f32.gmra.mxu1 %vm2276_vm8, %v668_v25 }
 0x11d   :  { %v1855_v27 = vpop.f32.mrf.mxu0 }
 0x11e   :  { %v938_v34 = vmul.f32 %v1855_v27, %v1119_v26 }
 0x11f   :  { %v1860_v35 = vpop.f32.mrf.mxu0 }
 0x120   :  { %v946_v41 = vsel %vm2276_vm8, %v938_v34, 0.0  ;;  %v937_v42 = vmul.f32 %v1118_v33, %v1860_v35 }
 0x121   :  { %v1866_v43 = vpop.f32.mrf.mxu0 }
 0x122   :  { %v945_v47 = vsel %vm2276_vm8, %v937_v42, 0.0  ;;  %v940_v48 = vmul.f32 %v1866_v43, %v1121_v38 }
 0x123   :  { %v947_v49 = vadd.f32 %v946_v41, %v945_v47  ;;  %v1872_v50 = vpop.f32.mrf.mxu0 }
 0x124   :  { %v939_v55 = vmul.f32 %v1120_v44, %v1872_v50  ;;  %v950_v58 = vsel %vm2276_vm8, %v940_v48, 0.0 }
 0x125   :  { %v1877_v56 = vpop.f32.mrf.mxu0 }
 0x126   :  { %v948_v59 = vsel %vm2276_vm8, %v939_v55, 0.0  ;;  %v942_v60 = vmul.f32 %v1877_v56, %v1123_v53  ;;  %v912_v53 = vld [vmem:[#allocation3] sm:$0x1] }
 0x127   :  { %v949_v63 = vadd.f32 %v948_v59, %v947_v49  ;;  %v1884_v0 = vpop.f32.mrf.mxu0  ;;  %v2328_v59 = vmov 0 }
 0x128   :  { %v941_v6 = vmul.f32 %v1122_v57, %v1884_v0  ;;  %v954_v20 = vsel %vm2276_vm8, %v942_v60, 0.0 }
 0x129   :  { %v951_v11 = vadd.f32 %v950_v58, %v949_v63  ;;  %v1888_v15 = vpop.f32.mrf.mxu0  ;;  %v2325_v58 = vmov 0 }
 0x12a   :  { %v952_v21 = vsel %vm2276_vm8, %v941_v6, 0.0  ;;  %v944_v22 = vmul.f32 %v1888_v15, %v1125_v4 }
 0x12b   :  { %v953_v23 = vadd.f32 %v952_v21, %v951_v11  ;;  %v1894_v24 = vpop.f32.mrf.mxu0 }
 0x12c   :  { %v943_v25 = vmul.f32 %v1124_v16, %v1894_v24  ;;  %v958_v33 = vsel %vm2276_vm8, %v944_v22, 0.0 }
 0x12d   :  { %v955_v26 = vadd.f32 %v954_v20, %v953_v23 }
 0x12e   :  { %v956_v34 = vsel %vm2276_vm8, %v943_v25, 0.0  ;;  %vm147_vm8 = vmor %vm129_vm0, %vm146_vm1 }
 0x12f   :  { %v957_v38 = vadd.f32 %v956_v34, %v955_v26  ;;  %vm1913_vm4 = vmor %vm147_vm8, %vm164_vm9  ;;  %vm130_vm8 = vcmp.ge.s32.totalorder %v1639_v1, 37  ;;  %vm131_vm9 = vcmp.lt.s32.totalorder %v1639_v1, 45 }
 0x130   :  { %v2329_v59 = vsel %vm1913_vm4, 4294967295, %v2328_v59  ;;  %vm2338_vm0 = vmmov %vm2331_vm12 }
 0x131   :  { %v959_v41 = vadd.f32 %v958_v33, %v957_v38  ;;  %2330 = vst [vmem:[#allocation33_spill] sm:$0xff] %v2329_v59  ;;  %v1940_v38 = vpop.f32.mrf.mxu1  ;;  %vm2340_vm1 = vmmov %vm2338_vm0 }
 0x133   :  { %v960_v42 = vrot.slane %v959_v41, 4 }
 0x135   :  { %v961_v44 = vadd.f32 %v960_v42, %v959_v41 }
 0x137   :  { %v962_v47 = vrot.slane %v961_v44, 2 }
 0x139   :  { %v963_v48 = vadd.f32 %v962_v47, %v961_v44 }
 0x13b   :  { %v964_v49 = vrot.slane %v963_v48, 1 }
 0x13d   :  { %v965_v55 = vadd.f32 %v964_v49, %v963_v48 }
 0x13f   :  { %v966_v57 = vadd.f32 %v965_v55, %v912_v53  ;;  %v1948_v55 = vpop.f32.mrf.mxu1 }
 0x141   :  { %967 = vst.msk [vmem:[#allocation3] sm:$0x1] %vm2275_vm10, %v966_v57  ;;  %vm154_vm10 = vmand %vm152_vm14, %vm153_vm15 }
 0x142   :  { %vm1909_vm6 = vmor %vm137_vm2, %vm154_vm10  ;;  %vm118_vm10 = vcmp.lt.s32.totalorder %v1639_v1, 8 }
 0x143   :  { %v2326_v58 = vsel %vm1909_vm6, 4294967295, %v2325_v58  ;;  %vm166_vm3 = vmor %vm1909_vm6, %vm1913_vm4 }
 0x144   :  { %2327 = vst [vmem:[#allocation32_spill] sm:$0xff] %v2326_v58  ;;  %v1922_v60 = vsel %vm166_vm3, 1, %v1571_v17  ;;  %vm2082_vm14 = vmand %vm130_vm8, %vm131_vm9 }
 0x145   :  { %vm439_vm5 = vcmp.eq.s32.totalorder %v1922_v60, 1  ;;  %vm2337_vm15 = vmmov %vm2331_vm12 }
 0x146   :  { %v440_v63 = vsel %vm439_vm5, %v1676_v8, 0.5  ;;  %v441_v4 = vsel %vm439_vm5, %v1685_v13, 0.5  ;;  %v442_v16 = vsel %vm439_vm5, %v1678_v9, 0.5  ;;  %v443_v22 = vsel %vm439_vm5, %v1696_v19, 0.5  ;;  %vm2108_vm2 = vmor %vm118_vm10, %vm2082_vm14 }
 0x147   :  { %v472_v6 = vsub.f32 1.0, %v440_v63  ;;  %v473_v11 = vsub.f32 1.0, %v441_v4  ;;  %v448_v20 = vadd.f32 1e-09, %v440_v63  ;;  %v449_v21 = vadd.f32 1e-09, %v441_v4  ;;  %vm2343_vm3 = vmmov %vm2338_vm0 }
 0x148   :  { %v474_v23 = vsub.f32 1.0, %v442_v16  ;;  %v444_v26 = vsel %vm439_vm5, %v1713_v28, 0.5  ;;  %v450_v33 = vadd.f32 1e-09, %v442_v16  ;;  %v451_v34 = vadd.f32 1e-09, %v443_v22  ;;  %vm2348_vm8 = vmmov %vm2338_vm0 }
 0x149   :  { %v480_v17 = vadd.f32 1e-09, %v472_v6  ;;  %v481_v25 = vadd.f32 1e-09, %v473_v11  ;;  %1380 = vlog2.f32 %v448_v20  ;;  %v475_v41 = vsub.f32 1.0, %v443_v22  ;;  %v1953_v11 = vpop.f32.mrf.mxu1  ;;  %vm2351_vm10 = vmmov %vm2338_vm0 }
 0x14a   :  { %1382 = vlog2.f32 %v449_v21  ;;  %v445_v42 = vsel %vm439_vm5, %v1715_v29, 0.5  ;;  %v476_v44 = vsub.f32 1.0, %v444_v26  ;;  %v482_v47 = vadd.f32 1e-09, %v474_v23 }
 0x14b   :  { %1384 = vlog2.f32 %v480_v17  ;;  %v452_v48 = vadd.f32 1e-09, %v444_v26  ;;  %v446_v49 = vsel %vm439_vm5, %v1725_v36, 0.5  ;;  %v453_v53 = vadd.f32 1e-09, %v445_v42  ;;  %v1957_v26 = vpop.f32.mrf.mxu1 }
 0x14c   :  { %1386 = vlog2.f32 %v481_v25  ;;  %v447_v57 = vsel %vm439_vm5, %v1727_v37, 0.5  ;;  %v477_v63 = vsub.f32 1.0, %v445_v42  ;;  %v483_v4 = vadd.f32 1e-09, %v475_v41 }
 0x14d   :  { %1388 = vlog2.f32 %v450_v33  ;;  %v484_v6 = vadd.f32 1e-09, %v476_v44  ;;  %v454_v16 = vadd.f32 1e-09, %v446_v49  ;;  %v478_v20 = vsub.f32 1.0, %v446_v49 }
 0x14e   :  { %1390 = vlog2.f32 %v451_v34  ;;  %v455_v21 = vadd.f32 1e-09, %v447_v57  ;;  %v479_v17 = vsub.f32 1.0, %v447_v57  ;;  %v485_v22 = vadd.f32 1e-09, %v477_v63 }
 0x14f   :  { %1392 = vlog2.f32 %v482_v47  ;;  %v512_v23 = vsub.f32 1.0, %v1739_v54  ;;  %v513_v25 = vsub.f32 1.0, %v1743_v61  ;;  %v486_v33 = vadd.f32 1e-09, %v478_v20 }
 0x150   :  { %1394 = vlog2.f32 %v452_v48  ;;  %v514_v41 = vsub.f32 1.0, %v1745_v62  ;;  %v515_v42 = vsub.f32 1.0, %v1751_v2  ;;  %v487_v44 = vadd.f32 1e-09, %v479_v17 }
 0x151   :  { %1396 = vlog2.f32 %v453_v53  ;;  %v516_v48 = vsub.f32 1.0, %v1753_v3  ;;  %v517_v49 = vsub.f32 1.0, %v1765_v5  ;;  %v520_v17 = vsel %vm439_vm5, %v512_v23, 0.0 }
 0x152   :  { %1398 = vlog2.f32 %v483_v4  ;;  %v570_v4 = vsub.f32 %v1685_v13, %v1743_v61  ;;  %v1980_v13 = vsel %vm1909_vm6, 1e-09, %v1572_v30  ;;  %v505_v30 = vsel %vm439_vm5, %v1743_v61, 0.0 }
 0x153   :  { %1400 = vlog2.f32 %v484_v6  ;;  %v522_v59 = vsel %vm439_vm5, %v514_v41, 0.0  ;;  %v523_v51 = vsel %vm439_vm5, %v515_v42, 0.0  ;;  %v507_v41 = vsel %vm439_vm5, %v1751_v2, 0.0 }
 0x154   :  { %1402 = vlog2.f32 %v454_v16  ;;  %v524_v42 = vsel %vm439_vm5, %v516_v48, 0.0  ;;  %v2334_v37 = vsub.f32 1.0, %v1768_v10  ;;  %v2339_v61 = vsub.f32 1.0, %v1775_v14 }
 0x155   :  { %1404 = vlog2.f32 %v455_v21  ;;  %v1971_v21 = vpop.f32.mrf.mxu1  ;;  %vm2372_vm14 = vcmask 908288  }
 0x156   :  { %v1381_v34 = vpop.eup %1380  ;;  %1406 = vlog2.f32 %v485_v22  ;;  %v521_v22 = vsel %vm439_vm5, %v513_v25, 0.0  ;;  %v504_v25 = vsel %vm439_vm5, %v1739_v54, 0.0 }
 0x157   :  { %v1383_v47 = vpop.eup %1382  ;;  %1408 = vlog2.f32 %v486_v33  ;;  %v457_v6 = vmul.f32 0.6931472, %v1381_v34  ;;  %v529_v33 = vadd.f32 %v1980_v13, %v520_v17 }
 0x158   :  { %v1385_v57 = vpop.eup %1384  ;;  %1410 = vlog2.f32 %v487_v44  ;;  %v459_v12 = vmul.f32 0.6931472, %v1383_v47  ;;  %v530_v44 = vadd.f32 %v1980_v13, %v521_v22  ;;  %v1998_v47 = vpop.f32.mrf.mxu1  ;;  %v506_v22 = vsel %vm439_vm5, %v1745_v62, 0.0 }
 0x159   :  { %v1387_v20 = vpop.eup %1386  ;;  %v489_v16 = vmul.f32 0.6931472, %v1385_v57  ;;  %v562_v57 = vmul.f32 %v1940_v38, %v1855_v27 }
 0x15a   :  { %v1389_v63 = vpop.eup %1388  ;;  %v491_v53 = vmul.f32 0.6931472, %v1387_v20  ;;  %v2021_v27 = vmul.f32 %v505_v30, %v459_v12  ;;  %v2029_v20 = vadd.f32 %v1980_v13, %v523_v51  ;;  %v561_v12 = vmul.f32 %v1948_v55, %v1860_v35 }
 0x15b   :  { %v1391_v23 = vpop.eup %1390  ;;  %v461_v58 = vmul.f32 0.6931472, %v1389_v63  ;;  %v2019_v63 = vmul.f32 %v504_v25, %v457_v6  ;;  %v2031_v45 = vmul.f32 %v529_v33, %v489_v16  ;;  %v2037_v6 = vpop.f32.mrf.mxu1  ;;  %v525_v30 = vsel %vm439_vm5, %v517_v49, 0.0 }
 0x15c   :  { %v1393_v34 = vpop.eup %1392  ;;  %v463_v17 = vmul.f32 0.6931472, %v1391_v23  ;;  %v2026_v23 = vadd.f32 %v1980_v13, %v522_v59  ;;  %v2033_v32 = vmul.f32 %v530_v44, %v491_v53  ;;  %v2045_v51 = vmul.f32 %v570_v4, %v562_v57 }
 0x15d   :  { %v1395_v52 = vpop.eup %1394  ;;  %v2039_v25 = vmul.f32 0.6931472, %v1393_v34  ;;  %v2043_v59 = vmul.f32 %v506_v22, %v461_v58  ;;  %v2048_v53 = vadd.f32 %v1980_v13, %v524_v42  ;;  %v508_v58 = vsel %vm439_vm5, %v1753_v3, 0.0 }
 0x15e   :  { %v1397_v7 = vpop.eup %1396  ;;  %v465_v33 = vmul.f32 0.6931472, %v1395_v52  ;;  %v2050_v44 = vmul.f32 %v507_v41, %v463_v17  ;;  %v509_v49 = vsel %vm439_vm5, %v1765_v5, 0.0  ;;  %v534_v17 = vadd.f32 %v1980_v13, %v525_v30 }
 0x15f   :  { %v1399_v38 = vpop.eup %1398  ;;  %v467_v34 = vmul.f32 0.6931472, %v1397_v7  ;;  %v2332_v41 = vsub.f32 %v1676_v8, %v1739_v54  ;;  %v2066_v7 = vpop.f32.mrf.mxu1  ;;  %v510_v8 = vsel %vm439_vm5, %v1768_v10, 0.0 }
 0x160   :  { %v1401_v48 = vpop.eup %1400  ;;  %v495_v57 = vmul.f32 0.6931472, %v1399_v38 }
 0x161   :  { %v1403_v46 = vpop.eup %1402  ;;  %v497_v22 = vmul.f32 0.6931472, %v1401_v48  ;;  %v2064_v42 = vmul.f32 %v2332_v41, %v561_v12  ;;  %v586_v48 = vand.u32 2147483647, %v2045_v51  ;;  %v511_v41 = vsel %vm439_vm5, %v1775_v14, 0.0 }
 0x162   :  { %v1405_v35 = vpop.eup %1404  ;;  %v469_v36 = vmul.f32 0.6931472, %v1403_v46 }
 0x163   :  { %v1407_v4 = vpop.eup %1406  ;;  %v471_v40 = vmul.f32 0.6931472, %v1405_v35 }
 0x164   :  { %v1409_v38 = vpop.eup %1408 }
 0x165   :  { %v1411_v12 = vpop.eup %1410  ;;  %v501_v31 = vmul.f32 0.6931472, %v1409_v38  ;;  %v566_v38 = vmul.f32 %v1971_v21, %v1877_v56  ;;  %v548_v56 = vmul.f32 %v2029_v20, %v495_v57 }
 0x166   :  { %v503_v60 = vmul.f32 0.6931472, %v1411_v12 }
 0x1b1   :  { %v1302_v16 = vpop.f32.mrf.mxu0 }
 0x1b2   :  { %v816_v55 = vsel %vm2331_vm12, %v1302_v16, 1.0  ;;  %vm2369_vm12 = vmmov %vm2338_vm0 }
 0x1b3   :  { %1412 = vlog2.f32 %v816_v55  ;;  %v776_v52 = vpop.f32.mrf.mxu0  ;;  %v526_v55 = vsel %vm439_vm5, %v2334_v37, 0.0  ;;  %v564_v37 = vmul.f32 %v1953_v11, %v1866_v43  ;;  %v527_v43 = vsel %vm439_vm5, %v2339_v61, 0.0  ;;  %vm2119_vm5 = vmand %vm148_vm7, %vm149_vm11 }
 0x1b4   :  { %v815_v16 = vsel %vm2333_vm13, %v776_v52, 1.0  ;;  %v499_v52 = vmul.f32 0.6931472, %v1407_v4  ;;  %v585_v11 = vand.u32 2147483647, %v2064_v42  ;;  %v536_v12 = vadd.f32 %v1980_v13, %v527_v43  ;;  %vm2141_vm9 = vmor %vm2108_vm2, %vm2119_vm5 }
 0x1b5   :  { %1414 = vlog2.f32 %v815_v16  ;;  %v1305_v30 = vpop.f32.mrf.mxu0  ;;  %v563_v16 = vmul.f32 %v1957_v26, %v1872_v50  ;;  %v2346_v26 = vsub.f32 %v1696_v19, %v1751_v2  ;;  %v543_v19 = vmul.f32 %v510_v8, %v469_v36  ;;  %vm2363_vm7 = vmmov %vm2338_vm0 }
 0x1b6   :  { %v818_v51 = vsel %vm2337_vm15, %v1305_v30, 1.0  ;;  %v1308_v35 = vpop.f32.mrf.mxu1  ;;  %v552_v57 = vmul.f32 %v536_v12, %v503_v60  ;;  %v553_v8 = vadd.f32 %v2031_v45, %v2019_v63  ;;  %v568_v50 = vmul.f32 %v2037_v6, %v1888_v15  ;;  %v2355_v6 = vld [vmem:[#allocation23_spill] sm:$0xff]  ;;  %vm2367_vm11 = vmmov %vm2338_vm0 }
 0x1b7   :  { %1416 = vlog2.f32 %v818_v51  ;;  %v820_v54 = vsel %vm2338_vm0, %v1308_v35, 1.0  ;;  %v786_v10 = vpop.f32.mrf.mxu0  ;;  %v580_v42 = vmul.f32 %v2346_v26, %v564_v37  ;;  %v541_v35 = vmul.f32 %v508_v58, %v465_v33  ;;  %vm2371_vm13 = vmmov %vm2338_vm0 }
 0x1b8   :  { %1418 = vlog2.f32 %v820_v54  ;;  %v817_v4 = vsel %vm2340_vm1, %v786_v10, 1.0  ;;  %v796_v30 = vpop.f32.mrf.mxu1  ;;  %v535_v54 = vadd.f32 %v1980_v13, %v526_v55  ;;  %v2347_v55 = vsub.f32 %v1678_v9, %v1745_v62  ;;  %v1428_v10 = vld [vmem:[#allocation4 + $0x8] sm:$0xff]  ;;  %vm2373_vm15 = vmmov %vm2372_vm14 }
 0x1b9   :  { %1420 = vlog2.f32 %v817_v4  ;;  %v819_v61 = vsel %vm2343_vm3, %v796_v30, 1.0  ;;  %v542_v4 = vmul.f32 %v509_v49, %v467_v34  ;;  %v547_v37 = vmul.f32 %v2026_v23, %v2039_v25  ;;  %vm2374_vm1 = vmmov %vm2338_vm0 }
 0x1ba   :  { %1422 = vlog2.f32 %v819_v61  ;;  %v1311_v46 = vpop.f32.mrf.mxu1  ;;  %v579_v51 = vmul.f32 %v2347_v55, %v563_v16  ;;  %v549_v13 = vmul.f32 %v2048_v53, %v497_v22  ;;  %v550_v33 = vmul.f32 %v534_v17, %v499_v52  ;;  %vm2375_vm2 = vmmov %vm2372_vm14 }
 0x1bb   :  { %v822_v1 = vsel %vm2348_vm8, %v1311_v46, 1.0  ;;  %v551_v36 = vmul.f32 %v535_v54, %v501_v31  ;;  %v588_v34 = vand.u32 2147483647, %v580_v42  ;;  %v2352_v23 = vsub.f32 %v1715_v29, %v1765_v5  ;;  %v2354_v42 = vld [vmem:[#allocation25_spill] sm:$0xff]  ;;  %vm2376_vm3 = vmmov %vm2338_vm0 }
 0x1bc   :  { %1424 = vlog2.f32 %v822_v1  ;;  %v806_v30 = vpop.f32.mrf.mxu1  ;;  %v565_v25 = vmul.f32 %v1998_v47, %v1884_v0  ;;  %v587_v58 = vand.u32 2147483647, %v579_v51  ;;  %v544_v49 = vmul.f32 %v511_v41, %v471_v40  ;;  %vm2377_vm5 = vmmov %vm2375_vm2 }
 0x1bd   :  { %v821_v21 = vsel %vm2351_vm10, %v806_v30, 1.0  ;;  %v582_v20 = vmul.f32 %v2352_v23, %v566_v38  ;;  %v596_v53 = vsel %vm2141_vm9, %v586_v48, 0.0  ;;  %v595_v31 = vsel %vm2141_vm9, %v585_v11, 0.0  ;;  %v2356_v30 = vld [vmem:[#allocation27_spill] sm:$0xff]  ;;  %vm2378_vm8 = vmmov %vm2338_vm0 }
 0x1be   :  { %1426 = vlog2.f32 %v821_v21  ;;  %v554_v29 = vadd.f32 %v2033_v32, %v2021_v27  ;;  %v555_v22 = vadd.f32 %v547_v37, %v2043_v59  ;;  %v556_v47 = vadd.f32 %v548_v56, %v2050_v44  ;;  %v2357_v56 = vld [vmem:[#allocation21_spill] sm:$0xff]  ;;  %vm2379_vm10 = vmmov %vm2375_vm2 }
 0x1bf   :  { %v2163_v40 = vadd.f32 %v549_v13, %v541_v35  ;;  %v2165_v17 = vadd.f32 %v550_v33, %v542_v4  ;;  %v598_v63 = vsel %vm2141_vm9, %v588_v34, 0.0  ;;  %v590_v48 = vand.u32 2147483647, %v582_v20  ;;  %v2359_v33 = vld [vmem:[#allocation20_spill] sm:$0xff]  ;;  %v2362_v20 = vld [vmem:[#allocation29_spill] sm:$0xff] }
 0x1c0   :  { %v1413_v16 = vpop.eup %1412  ;;  %v2353_v52 = vsub.f32 %v1713_v28, %v1753_v3  ;;  %v2172_v43 = vadd.f32 %v551_v36, %v543_v19  ;;  %v597_v32 = vsel %vm2141_vm9, %v587_v58, 0.0  ;;  %v2177_v44 = vadd.f32 %v552_v57, %v544_v49  ;;  %v2360_v36 = vld [vmem:[#allocation24_spill] sm:$0xff] }
 0x1c1   :  { %v826_v0 = vmul.f32 0.6931472, %v1413_v16  ;;  %v567_v61 = vmul.f32 %v2066_v7, %v1894_v24  ;;  %v871_v60 = vadd.f32 %v595_v31, %v553_v8  ;;  %v872_v28 = vadd.f32 %v596_v53, %v554_v29  ;;  %v1429_v24 = vld [vmem:[#allocation4] sm:$0xff]  ;;  %v2364_v8 = vld [vmem:[#allocation22_spill] sm:$0xff] }
 0x1c2   :  { %v1415_v45 = vpop.eup %1414  ;;  %v581_v41 = vmul.f32 %v2353_v52, %v565_v25  ;;  %v874_v12 = vadd.f32 %v598_v63, %v556_v47  ;;  %v600_v55 = vsel %vm2141_vm9, %v590_v48, 0.0  ;;  %v873_v35 = vadd.f32 %v597_v32, %v555_v22  ;;  %v1430_v53 = vld [vmem:[#allocation4 + $0x18] sm:$0xff]  ;;  %v1431_v47 = vld [vmem:[#allocation4 + $0x28] sm:$0xff] }
 0x1c3   :  { %v840_v27 = vadd.f32 %v826_v0, %v1803_v39  ;;  %v824_v59 = vmul.f32 0.6931472, %v1415_v45  ;;  %v2358_v21 = vsub.f32 %v2357_v56, %v1775_v14  ;;  %v2361_v34 = vsub.f32 %v2359_v33, %v2360_v36  ;;  %v2365_v29 = vld [vmem:[#allocation26_spill] sm:$0xff]  ;;  %v2366_v63 = vld [vmem:[#allocation28_spill] sm:$0xff] }
 0x1c4   :  { %v1417_v11 = vpop.eup %1416  ;;  %v589_v51 = vand.u32 2147483647, %v581_v41 }
 0x1c5   :  { %v1419_v54 = vpop.eup %1418  ;;  %v848_v26 = vsub.f32 %v840_v27, %v1428_v10  ;;  %v839_v38 = vadd.f32 %v824_v59, %v2354_v42  ;;  %v830_v46 = vmul.f32 0.6931472, %v1417_v11  ;;  %v584_v13 = vmul.f32 %v2358_v21, %v568_v50  ;;  %v1432_v59 = vld [vmem:[#allocation4 + $0x10] sm:$0xff] }
 0x1c6   :  { %v1421_v39 = vpop.eup %1420  ;;  %v834_v1 = vmul.f32 0.6931472, %v1419_v54  ;;  %v583_v23 = vmul.f32 %v2361_v34, %v567_v61  ;;  %v599_v0 = vsel %vm2141_vm9, %v589_v51, 0.0  ;;  %v1433_v54 = vld [vmem:[#allocation4 + $0x20] sm:$0xff] }
 0x1c7   :  { %v1423_v15 = vpop.eup %1422  ;;  %v856_v4 = vmul.f32 %v848_v26, %v2355_v6  ;;  %v847_v7 = vsub.f32 %v839_v38, %v1429_v24  ;;  %v842_v19 = vadd.f32 %v830_v46, %v2356_v30  ;;  %v828_v37 = vmul.f32 0.6931472, %v1421_v39  ;;  %v2368_v26 = vld [vmem:[#allocation31_spill] sm:$0xff] }
 0x1c8   :  { %v844_v25 = vadd.f32 %v834_v1, %v2362_v20  ;;  %v832_v58 = vmul.f32 0.6931472, %v1423_v15  ;;  %v591_v61 = vand.u32 2147483647, %v583_v23  ;;  %v592_v15 = vand.u32 2147483647, %v584_v13 }
 0x1c9   :  { %v1425_v49 = vpop.eup %1424  ;;  %v864_v57 = vsel %vm2363_vm7, %v856_v4, 0.0  ;;  %v855_v16 = vmul.f32 %v847_v7, %v2364_v8  ;;  %v850_v31 = vsub.f32 %v842_v19, %v1430_v53  ;;  %v841_v22 = vadd.f32 %v828_v37, %v2365_v29  ;;  %v1434_v6 = vld [vmem:[#allocation4 + $0x38] sm:$0xff]  ;;  %vm2380_vm7 = vmmov %vm2375_vm2 }
 0x1ca   :  { %v852_v45 = vsub.f32 %v844_v25, %v1431_v47  ;;  %v843_v48 = vadd.f32 %v832_v58, %v2366_v63  ;;  %v838_v52 = vmul.f32 0.6931472, %v1425_v49  ;;  %v880_v50 = vadd.f32 %v872_v28, %v864_v57  ;;  %v2370_v28 = vld [vmem:[#allocation30_spill] sm:$0xff] }
 0x1cb   :  { %v1427_v41 = vpop.eup %1426  ;;  %v863_v32 = vsel %vm2367_vm11, %v855_v16, 0.0  ;;  %v858_v27 = vmul.f32 %v850_v31, %v1751_v2  ;;  %v849_v11 = vsub.f32 %v841_v22, %v1432_v59  ;;  %v875_v30 = vadd.f32 %v599_v0, %v2163_v40  ;;  %vm2381_vm11 = vmmov %vm2375_vm2 }
 0x1cc   :  { %v851_v10 = vsub.f32 %v843_v48, %v1433_v54  ;;  %v846_v42 = vadd.f32 %v838_v52, %v2368_v26  ;;  %v836_v38 = vmul.f32 0.6931472, %v1427_v41  ;;  %v860_v39 = vmul.f32 %v852_v45, %v1765_v5  ;;  %v1435_v5 = vld [vmem:[#allocation4 + $0x30] sm:$0xff] }
 0x1cd   :  { %v866_v46 = vsel %vm2369_vm12, %v858_v27, 0.0  ;;  %v857_v51 = vmul.f32 %v849_v11, %v1745_v62  ;;  %v879_v1 = vadd.f32 %v871_v60, %v863_v32  ;;  %v889_v37 = vsel %vm2373_vm15, %v880_v50, 0.0  ;;  %vm2382_vm12 = vmmov %vm2375_vm2  ;;  %v972_v11 = vld [vmem:[#allocation3] sm:$0x1]  ;;  %v973_v50 = vld [vmem:[%s2273_s5] sm:$0x1] }
 0x1ce   :  { %v859_v2 = vmul.f32 %v851_v10, %v1753_v3  ;;  %v854_v4 = vsub.f32 %v846_v42, %v1434_v6  ;;  %v845_v24 = vadd.f32 %v836_v38, %v2370_v28  ;;  %v882_v3 = vadd.f32 %v874_v12, %v866_v46  ;;  %v2388_v46 = vld [vmem:[#allocation18_spill] sm:$0xff] }
 0x1cf   :  { %v865_v7 = vsel %vm2371_vm13, %v857_v51, 0.0  ;;  %v888_v19 = vsel %vm2372_vm14, %v879_v1, 0.0  ;;  %v601_v21 = vsel %vm2141_vm9, %v591_v61, 0.0  ;;  %v868_v13 = vsel %vm2374_vm1, %v860_v39, 0.0 }
 0x1d0   :  { %v867_v62 = vsel %vm2338_vm0, %v859_v2, 0.0  ;;  %v853_v60 = vsub.f32 %v845_v24, %v1435_v5  ;;  %v881_v56 = vadd.f32 %v873_v35, %v865_v7  ;;  %v862_v33 = vmul.f32 %v854_v4, %v1775_v14  ;;  %v2392_v4 = vld [vmem:[#allocation19_spill] sm:$0xff] }
 0x1d1   :  { %v890_v40 = vadd.f32 %v889_v37, %v888_v19  ;;  %v876_v23 = vadd.f32 %v600_v55, %v2165_v17  ;;  %v883_v20 = vadd.f32 %v875_v30, %v867_v62  ;;  %v602_v35 = vsel %vm2141_vm9, %v592_v15, 0.0 }
 0x1d2   :  { %v861_v34 = vmul.f32 %v853_v60, %v2360_v36  ;;  %v891_v25 = vsel %vm2375_vm2, %v881_v56, 0.0  ;;  %v877_v49 = vadd.f32 %v601_v21, %v2172_v43  ;;  %v893_v14 = vsel %vm2377_vm5, %v882_v3, 0.0 }
 0x1d3   :  { %v892_v12 = vadd.f32 %v891_v25, %v890_v40  ;;  %v884_v57 = vadd.f32 %v876_v23, %v868_v13  ;;  %v870_v36 = vsel %vm2378_vm8, %v862_v33, 0.0  ;;  %v878_v17 = vadd.f32 %v602_v35, %v2177_v44  ;;  %v887_v44 = vld [vmem:[#allocation2] sm:$0x1] }
 0x1d4   :  { %v869_v58 = vsel %vm2376_vm3, %v861_v34, 0.0  ;;  %v895_v16 = vsel %vm2379_vm10, %v883_v20, 0.0  ;;  %vm2383_vm13 = vcmask 901120   ;;  %vm2389_vm0 = vnez %v2388_v46 }
 0x1d5   :  { %v894_v8 = vadd.f32 %v893_v14, %v892_v12  ;;  %v885_v55 = vadd.f32 %v877_v49, %v869_v58  ;;  %v886_v31 = vadd.f32 %v878_v17, %v870_v36  ;;  %v897_v29 = vsel %vm2380_vm7, %v884_v57, 0.0  ;;  %vm2386_vm14 = vmmov %vm2383_vm13 }
 0x1d6   :  { %vm2387_vm15 = vmmov %vm2383_vm13  ;;  %v974_v1 = vmul.f32 %v973_v50, %v972_v11  ;;  %vm1072_vm5 = vcmask 0  }
 0x1d7   :  { %v896_v53 = vadd.f32 %v895_v16, %v894_v8  ;;  %v899_v0 = vsel %vm2381_vm11, %v885_v55, 0.0  ;;  %v901_v47 = vsel %vm2382_vm12, %v886_v31, 0.0  ;;  %vm2390_vm1 = vmmov %vm2383_vm13 }
 0x1d8   :  { %vm2391_vm2 = vmmov %vm2390_vm1  ;;  %v1035_v6 = vsel %vm2389_vm0, %v974_v1, 0.0 }
 0x1d9   :  { %v898_v22 = vadd.f32 %v897_v29, %v896_v53  ;;  %vm2395_vm3 = vmmov %vm2390_vm1 }
 0x1db   :  { %v900_v43 = vadd.f32 %v899_v0, %v898_v22 }
 0x1dd   :  { %v902_v45 = vadd.f32 %v901_v47, %v900_v43 }
 0x1df   :  { %v903_v63 = vrot.slane %v902_v45, 4 }
 0x1e1   :  { %v904_v18 = vadd.f32 %v903_v63, %v902_v45 }
 0x1e3   :  { %v905_v48 = vrot.slane %v904_v18, 2 }
 0x1e5   :  { %v906_v52 = vadd.f32 %v905_v48, %v904_v18 }
 0x1e7   :  { %v907_v41 = vrot.slane %v906_v52, 1 }
 0x1e9   :  { %v908_v32 = vadd.f32 %v907_v41, %v906_v52 }
 0x1eb   :  { %v909_v27 = vadd.f32 %v908_v32, %v887_v44 }
 0x1ed   :  { %911 = vst.msk [vmem:[#allocation2] sm:$0x1] %vm2383_vm13, %v909_v27 }
 0x1f4   :  { %v971_v59 = vld [vmem:[#allocation2] sm:$0x1] }
 0x1f5   :  { %v987_v54 = vsel %vm1913_vm4, %v971_v59, 0.0  ;;  %v975_v26 = vsel %vm1909_vm6, %v971_v59, 0.0  ;;  %v1011_v39 = vsel %vm2389_vm0, %v971_v59, 0.0  ;;  %v999_v51 = vsel %vm2141_vm9, %v971_v59, 0.0  ;;  %vm2394_vm6 = vmmov %vm2390_vm1 }
 0x1f6   :  { %v988_v42 = vsel %vm2386_vm14, %v987_v54, 0.0  ;;  %v976_v38 = vsel %vm2387_vm15, %v975_v26, 0.0  ;;  %v1012_v15 = vsel %vm2390_vm1, %v1011_v39, 0.0  ;;  %v1000_v2 = vsel %vm2391_vm2, %v999_v51, 0.0  ;;  %vm2396_vm9 = vmmov %vm2390_vm1 }
 0x1f7   :  { %989 = vadd.xlane.f32.xlu1 %v988_v42  ;;  %977 = vadd.xlane.f32.xlu0 %v976_v38  ;;  %vm2393_vm4 = vnez %v2392_v4  ;;  %v1036_v24 = vsel %vm2394_vm6, %v1035_v6, 0.0 }
 0x1f8   :  { %v1023_v28 = vsel %vm2393_vm4, %v971_v59, 0.0  ;;  %v1047_v9 = vsel %vm2393_vm4, %v974_v1, 0.0 }
 0x1f9   :  { %v1024_v7 = vsel %vm2395_vm3, %v1023_v28, 0.0  ;;  %v1048_v30 = vsel %vm2396_vm9, %v1047_v9, 0.0 }
 0x1fb   :  { %1013 = vadd.xlane.f32.xlu1 %v1012_v15  ;;  %1001 = vadd.xlane.f32.xlu0 %v1000_v2 }
 0x1ff   :  { %1037 = vadd.xlane.f32.xlu1 %v1036_v24  ;;  %1025 = vadd.xlane.f32.xlu0 %v1024_v7 }
 0x203   :  { %1049 = vadd.xlane.f32.xlu0 %v1048_v30 }
 0x280   :  { %v990_v19 = vpop.xlane.xlu1 %989  ;;  %v978_v37 = vpop.xlane.xlu0 %977 }
 0x281   :  { %v991_v62 = vrot.slane %v990_v19, 4  ;;  %v979_v5 = vrot.slane %v978_v37, 4 }
 0x283   :  { %v992_v60 = vadd.f32 %v991_v62, %v990_v19  ;;  %v980_v56 = vadd.f32 %v979_v5, %v978_v37 }
 0x284   :  { %v1014_v3 = vpop.xlane.xlu1 %1013  ;;  %v1002_v21 = vpop.xlane.xlu0 %1001 }
 0x285   :  { %v993_v13 = vrot.slane %v992_v60, 2  ;;  %v981_v33 = vrot.slane %v980_v56, 2  ;;  %v1015_v40 = vrot.slane %v1014_v3, 4  ;;  %v1003_v34 = vrot.slane %v1002_v21, 4 }
 0x287   :  { %v1016_v23 = vadd.f32 %v1015_v40, %v1014_v3  ;;  %v1004_v20 = vadd.f32 %v1003_v34, %v1002_v21  ;;  %v982_v25 = vadd.f32 %v981_v33, %v980_v56  ;;  %v994_v35 = vadd.f32 %v993_v13, %v992_v60 }
 0x288   :  { %v1038_v12 = vpop.xlane.xlu1 %1037  ;;  %v1026_v58 = vpop.xlane.xlu0 %1025 }
 0x289   :  { %v1017_v49 = vrot.slane %v1016_v23, 2  ;;  %v1005_v57 = vrot.slane %v1004_v20, 2  ;;  %v1039_v14 = vrot.slane %v1038_v12, 4  ;;  %v1027_v36 = vrot.slane %v1026_v58, 4 }
 0x28a   :  { %v983_v8 = vrot.slane %v982_v25, 1  ;;  %v995_v17 = vrot.slane %v994_v35, 1 }
 0x28b   :  { %v1040_v55 = vadd.f32 %v1039_v14, %v1038_v12  ;;  %v1028_v16 = vadd.f32 %v1027_v36, %v1026_v58  ;;  %v1006_v53 = vadd.f32 %v1005_v57, %v1004_v20  ;;  %v1018_v31 = vadd.f32 %v1017_v49, %v1016_v23 }
 0x28c   :  { %v1050_v29 = vpop.xlane.xlu0 %1049  ;;  %v984_v22 = vadd.f32 %v983_v8, %v982_v25  ;;  %v996_v0 = vadd.f32 %v995_v17, %v994_v35 }
 0x28d   :  { %v1041_v43 = vrot.slane %v1040_v55, 2  ;;  %v1029_v47 = vrot.slane %v1028_v16, 2  ;;  %v1051_v45 = vrot.slane %v1050_v29, 4  ;;  %v1007_v63 = vrot.slane %v1006_v53, 1 }
 0x28e   :  { %1340 = vpush %v984_v22  ;;  %v1019_v18 = vrot.slane %v1018_v31, 1 }
 0x28f   :  { %v1042_v48 = vadd.f32 %v1041_v43, %v1040_v55  ;;  %v1052_v52 = vadd.f32 %v1051_v45, %v1050_v29  ;;  %1342 = vpush %v996_v0  ;;  %v1008_v41 = vadd.f32 %v1007_v63, %v1006_v53  ;;  %v1030_v44 = vadd.f32 %v1029_v47, %v1028_v16 }
 0x290   :  { %v1020_v32 = vadd.f32 %v1019_v18, %v1018_v31 }
 0x291   :  { %v1053_v27 = vrot.slane %v1052_v52, 2  ;;  %1344 = vpush %v1008_v41  ;;  %v1031_v59 = vrot.slane %v1030_v44, 1  ;;  %v1043_v11 = vrot.slane %v1042_v48, 1 }
 0x292   :  { %1346 = vpush %v1020_v32 }
 0x293   :  { %v1054_v50 = vadd.f32 %v1053_v27, %v1052_v52  ;;  %v1032_v61 = vadd.f32 %v1031_v59, %v1030_v44  ;;  %v1044_v54 = vadd.f32 %v1043_v11, %v1042_v48 }
 0x295   :  { %1348 = vpush %v1032_v61  ;;  %v1055_v10 = vrot.slane %v1054_v50, 1 }
 0x296   :  { %1350 = vpush %v1044_v54 }
 0x297   :  { %v1056_v26 = vadd.f32 %v1055_v10, %v1054_v50 }
 0x299   :  { %1352 = vpush %v1056_v26 }
 0x2bf   :  { %s1341_s5 = spop %1340 }
 0x2c0   :  { %v986_v42 = vstv %s1341_s5  ;;  %s1343_s21 = spop %1342 }
 0x2c1   :  { %v1059_v38 = vsub.f32 0.0, %v986_v42  ;;  %v998_v39 = vstv %s1343_s21 }
 0x2c2   :  { %s1345_s22 = spop %1344  ;;  %v1062_v1 = vsub.f32 0.0, %v998_v39 }
 0x2c3   :  { %v1061_v46 = vmul.f32 0.125, %v1059_v38  ;;  %s1347_s23 = spop %1346  ;;  %v1010_v28 = vstv %s1345_s22 }
 0x2c4   :  { %v1022_v2 = vstv %s1347_s23 }
 0x2c5   :  { %v1065_v51 = vmul.f32 10.0, %v1061_v46 }
 0x2c6   :  { %s1349_s24 = spop %1348 }
 0x2c7   :  { %s1351_s25 = spop %1350  ;;  %v1066_v15 = vadd.f32 %v1065_v51, %v1062_v1  ;;  %v1034_v24 = vstv %s1349_s24 }
 0x2c8   :  { %v1046_v6 = vstv %s1351_s25 }
 0x2c9   :  { %v1063_v4 = vmul.f32 %v1046_v6, %v1022_v2  ;;  %v1067_v30 = vadd.f32 %v1066_v15, %v1010_v28 }
 0x2ca   :  { %s1353_s26 = spop %1352 }
 0x2cb   :  { %v1068_v7 = vmul.f32 0.01, %v1063_v4  ;;  %v1058_v9 = vstv %s1353_s26 }
 0x2cc   :  { %v1064_v19 = vmul.f32 %v1058_v9, %v1034_v24 }
 0x2cd   :  { %v1069_v37 = vadd.f32 %v1068_v7, %v1067_v30 }
 0x2ce   :  { %v1070_v62 = vmul.f32 0.01, %v1064_v19 }
 0x2d0   :  { %v1071_v5 = vadd.f32 %v1070_v62, %v1069_v37 }
 0x2d2   :  { %1073 = vst.msk [vmem:[#allocation13] sm:$0x1] %vm1072_vm5, %v1071_v5 }
 0x2d3   :  { %1547 = shalt.err (!%p1544_p1)
}
 0x2d4   :  { %1083 = dma.vmem_to_hbm [thread:$0]  %s1081_s28, 16, %s2274_s6, [#allocation6]  }
 0x2d5   :  { %1562 = dma.done.wait [#allocation6], 16  }
 0x2d6   :  { %1563 = vsyncadd [#allocation6], 4294967280 }
 0x2d7   :  { %1087 = vsyncpa [#allocation5], 1 }
 0x2d8   :  { %1088 = vsyncpa [#allocation8], 1 }
 0x2d9   :  { %1089 = vsyncpa [#allocation11], 1 }
 0x2da   :  { %1090 = vsyncpa [#allocation6], 1 }

</bundles_post_ra>
